<compile_context>
chip_gen: v7x
topology: tpu7x:2x2x1
jax: 0.10.0
libtpu: 0.0.40
codegen_flags: <defaults>
</compile_context>

<pallas_src>
import jax
import jax.numpy as jnp
from jax import lax
from jax.experimental import pallas as pl
from jax.experimental.pallas import tpu as pltpu


# ----------------------------------------------------------------------------
# Fused Pallas kernel: one batch element per grid step, torch (C, N) layout I/O
# ----------------------------------------------------------------------------
def _sa_layer_kernel(x_ref, xyz_ref, wqk_ref, wv_ref, bv_ref,
                     wt_ref, bt_ref, scale_ref, shift_ref, o_ref):
    # x_ref / xyz_ref / o_ref blocks: (1, C, N) in the PyTorch channels-first layout.
    x_cn = x_ref[0].astype(jnp.float32)              # (C, N)
    xyz_cn = xyz_ref[0].astype(jnp.float32)          # (C, N)
    x = (x_cn + xyz_cn).T                            # (N, C) channels-last (XLU transpose)

    # Shared q/k projection (q_conv.weight is tied to k_conv.weight, bias=False).
    q = jnp.dot(x, wqk_ref[...], preferred_element_type=jnp.float32)          # (N, C//4)

    # energy[i, j] = q_i . q_j   ==  torch.bmm(x_q, x_k) with the tied weights.
    energy = lax.dot_general(q, q, (((1,), (1,)), ((), ())),
                             preferred_element_type=jnp.float32)              # (N, N)

    # Row softmax over the last axis (numerically stabilized; equivalent to torch).
    energy = energy - jnp.max(energy, axis=-1, keepdims=True)
    att = jnp.exp(energy)
    att = att / jnp.sum(att, axis=-1, keepdims=True)                          # (N, N)

    # Column renormalization: attention / (1e-9 + attention.sum(dim=1, keepdim=True)).
    # Transpose once so both the reduce (lane axis) and the weighted sum (MXU) are cheap.
    att_t = att.T                                                             # (N, N)
    denom = jnp.sum(att_t, axis=-1, keepdims=True)                            # (N, 1)
    att_t = att_t / (1e-9 + denom)

    # Value projection and x_r = torch.bmm(x_v, attention)  (channels-last: att^T @ v).
    v = jnp.dot(x, wv_ref[...], preferred_element_type=jnp.float32) + bv_ref[...]   # (N, C)
    x_r = jnp.dot(att_t, v, preferred_element_type=jnp.float32)                     # (N, C)

    # trans_conv + folded BatchNorm (inference stats) + ReLU, then residual add.
    t = jnp.dot(x - x_r, wt_ref[...], preferred_element_type=jnp.float32) + bt_ref[...]
    t = t * scale_ref[...] + shift_ref[...]
    t = jnp.maximum(t, 0.0)
    out = x + t                                                               # (N, C)

    o_ref[0] = out.T.astype(o_ref.dtype)                                      # store as (C, N)


def sa_layer_forward(x, xyz, params):
    """SA_Layer.forward.  x, xyz: (B, C, N) torch layout  ->  (B, C, N)."""
    B, C, N = x.shape
    wqk, wv, bv, wt, bt, bn_scale, bn_shift = params
    C4 = wqk.shape[1]
    assert C % 128 == 0 and N % 128 == 0, "use lane-dense C, N (multiples of 128)"

    flops = B * 2 * N * (C * C4 + N * C4 + 2 * C * C + N * C)
    bytes_accessed = 4 * (3 * B * C * N + C * C4 + 2 * C * C + 4 * C)

    grid_spec = pltpu.PrefetchScalarGridSpec(
        num_scalar_prefetch=0,
        grid=(B,),
        in_specs=[
            pl.BlockSpec((1, C, N), lambda b: (b, 0, 0)),   # x
            pl.BlockSpec((1, C, N), lambda b: (b, 0, 0)),   # xyz
            pl.BlockSpec((C, C4), lambda b: (0, 0)),        # w_qk (shared q/k, no bias)
            pl.BlockSpec((C, C), lambda b: (0, 0)),         # w_v
            pl.BlockSpec((1, C), lambda b: (0, 0)),         # b_v
            pl.BlockSpec((C, C), lambda b: (0, 0)),         # w_trans
            pl.BlockSpec((1, C), lambda b: (0, 0)),         # b_trans
            pl.BlockSpec((1, C), lambda b: (0, 0)),         # BN scale (gamma/sqrt(var+eps))
            pl.BlockSpec((1, C), lambda b: (0, 0)),         # BN shift (beta - mean*scale)
        ],
        out_specs=pl.BlockSpec((1, C, N), lambda b: (b, 0, 0)),
    )

    return pl.pallas_call(
        _sa_layer_kernel,
        out_shape=jax.ShapeDtypeStruct((B, C, N), x.dtype),
        grid_spec=grid_spec,
        compiler_params=pltpu.CompilerParams(
            dimension_semantics=("parallel",),
            vmem_limit_bytes=32 * 1024 * 1024),
        cost_estimate=pl.CostEstimate(
            flops=flops, transcendentals=B * N * N, bytes_accessed=bytes_accessed),
    )(x, xyz, wqk, wv, bv, wt, bt, bn_scale, bn_shift)


# ----------------------------------------------------------------------------
# Pure-JAX reference (mirrors the PyTorch forward) for a correctness check
# ----------------------------------------------------------------------------
def sa_layer_reference(x, xyz, params):
    wqk, wv, bv, wt, bt, scale, shift = params
    hp = lax.Precision.HIGHEST
    xs = jnp.transpose(x + xyz, (0, 2, 1))                                  # (B, N, C)
    q = jnp.einsum('bnc,cd->bnd', xs, wqk, precision=hp)                    # (B, N, C//4)
    energy = jnp.einsum('bic,bjc->bij', q, q, precision=hp)                 # (B, N, N)
    att = jax.nn.softmax(energy, axis=-1)
    att = att / (1e-9 + jnp.sum(att, axis=1, keepdims=True))
    v = jnp.einsum('bnc,cd->bnd', xs, wv, precision=hp) + bv
    x_r = jnp.einsum('bij,bic->bjc', att, v, precision=hp)                  # (B, N, C)
    t = jnp.einsum('bnc,cd->bnd', xs - x_r, wt, precision=hp) + bt
    t = jnp.maximum(t * scale + shift, 0.0)
    return jnp.transpose(xs + t, (0, 2, 1))                                 # (B, C, N)


def make_params(key, C):
    kq, kv, kbv, kt, kbt, kg, kb = jax.random.split(key, 7)
    C4 = C // 4
    s = 1.0 / jnp.sqrt(jnp.float32(C))
    wqk = jax.random.normal(kq, (C, C4), jnp.float32) * s
    wv = jax.random.normal(kv, (C, C), jnp.float32) * s
    bv = jax.random.normal(kbv, (1, C), jnp.float32) * 0.1
    wt = jax.random.normal(kt, (C, C), jnp.float32) * s
    bt = jax.random.normal(kbt, (1, C), jnp.float32) * 0.1
    # BatchNorm1d folded to per-channel affine (inference running stats).
    gamma = 1.0 + 0.1 * jax.random.normal(kg, (1, C), jnp.float32)
    beta = 0.1 * jax.random.normal(kb, (1, C), jnp.float32)
    mean = jnp.zeros((1, C), jnp.float32)
    var = jnp.ones((1, C), jnp.float32)
    scale = gamma / jnp.sqrt(var + 1e-5)
    shift = beta - mean * scale
    # TODO(synk): training-mode BatchNorm (batch statistics over B*N) is not replicated;
    # the kernel implements the folded inference-mode scale/shift.
    return (wqk, wv, bv, wt, bt, scale, shift)


if __name__ == "__main__":
    key = jax.random.PRNGKey(0)
    B, C, N = 2, 128, 128          # lane-dense channels / points, small batch

    kx, kz, kp = jax.random.split(key, 3)
    x = jax.random.normal(kx, (B, C, N), jnp.float32)
    xyz = jax.random.normal(kz, (B, C, N), jnp.float32)
    params = make_params(kp, C)

    out = sa_layer_forward(x, xyz, params)
    out = jax.block_until_ready(out)
    assert out.shape == (B, C, N)

    ref = jax.block_until_ready(sa_layer_reference(x, xyz, params))
    assert jnp.all(jnp.isfinite(out))
    assert jnp.allclose(out, ref, rtol=1e-2, atol=1e-2), (
        "kernel output mismatch vs reference")

    print("KERNEL_OK")
</pallas_src>

<mosaic_0001>
module attributes {stable_mosaic.version = 11 : i64} {
  func.func @_sa_layer_kernel(%arg0: i32, %arg1: memref<1x128x128xf32, #tpu.memory_space<vmem>>, %arg2: memref<1x128x128xf32, #tpu.memory_space<vmem>>, %arg3: memref<128x32xf32, #tpu.memory_space<vmem>>, %arg4: memref<128x128xf32, #tpu.memory_space<vmem>>, %arg5: memref<1x128xf32, #tpu.memory_space<vmem>>, %arg6: memref<128x128xf32, #tpu.memory_space<vmem>>, %arg7: memref<1x128xf32, #tpu.memory_space<vmem>>, %arg8: memref<1x128xf32, #tpu.memory_space<vmem>>, %arg9: memref<1x128xf32, #tpu.memory_space<vmem>>, %arg10: memref<1x128x128xf32, #tpu.memory_space<vmem>>) attributes {dimension_semantics = [#tpu.dimension_semantics<parallel>], iteration_bounds = array<i64: 2>, scalar_prefetch = 0 : i64, scratch_operands = 0 : i64, tpu.core_type = #tpu.core_type<tc>, window_params = [{transform_indices = @transform_0, window_bounds = array<i64: 1, 128, 128>}, {transform_indices = @transform_1, window_bounds = array<i64: 1, 128, 128>}, {pipeline_mode = #tpu.pipeline_mode<synchronous>, transform_indices = @transform_2, window_bounds = array<i64: 128, 32>}, {pipeline_mode = #tpu.pipeline_mode<synchronous>, transform_indices = @transform_3, window_bounds = array<i64: 128, 128>}, {pipeline_mode = #tpu.pipeline_mode<synchronous>, transform_indices = @transform_4, window_bounds = array<i64: 1, 128>}, {pipeline_mode = #tpu.pipeline_mode<synchronous>, transform_indices = @transform_5, window_bounds = array<i64: 128, 128>}, {pipeline_mode = #tpu.pipeline_mode<synchronous>, transform_indices = @transform_6, window_bounds = array<i64: 1, 128>}, {pipeline_mode = #tpu.pipeline_mode<synchronous>, transform_indices = @transform_7, window_bounds = array<i64: 1, 128>}, {pipeline_mode = #tpu.pipeline_mode<synchronous>, transform_indices = @transform_8, window_bounds = array<i64: 1, 128>}, {transform_indices = @transform_9, window_bounds = array<i64: 1, 128, 128>}]} {
    %c0 = arith.constant 0 : index
    %c0_0 = arith.constant 0 : index
    %c0_1 = arith.constant 0 : index
    %0 = vector.load %arg1[%c0, %c0_0, %c0_1] : memref<1x128x128xf32, #tpu.memory_space<vmem>>, vector<1x128x128xf32>
    %1 = vector.shape_cast %0 : vector<1x128x128xf32> to vector<128x128xf32>
    %c0_2 = arith.constant 0 : index
    %c0_3 = arith.constant 0 : index
    %c0_4 = arith.constant 0 : index
    %2 = vector.load %arg2[%c0_2, %c0_3, %c0_4] : memref<1x128x128xf32, #tpu.memory_space<vmem>>, vector<1x128x128xf32>
    %3 = vector.shape_cast %2 : vector<1x128x128xf32> to vector<128x128xf32>
    %4 = arith.addf %1, %3 : vector<128x128xf32>
    %5 = tpu.transpose %4, [1, 0] : vector<128x128xf32> -> vector<128x128xf32>
    %c0_5 = arith.constant 0 : index
    %c0_6 = arith.constant 0 : index
    %6 = vector.load %arg3[%c0_5, %c0_6] : memref<128x32xf32, #tpu.memory_space<vmem>>, vector<128x32xf32>
    %cst = arith.constant dense<0.000000e+00> : vector<128x32xf32>
    %7 = tpu.matmul %5, %6, %cst {dimension_numbers = #tpu.dot_dimension_numbers<[1], [0], [0], [1], [0, 0, 1, 1], [], []>} : vector<128x128xf32>, vector<128x32xf32>, vector<128x32xf32> -> vector<128x32xf32>
    %cst_7 = arith.constant dense<0.000000e+00> : vector<128x128xf32>
    %8 = tpu.matmul %7, %7, %cst_7 {dimension_numbers = #tpu.dot_dimension_numbers<[1], [1], [0], [0], [0, 0, 1, 0], [], []>} : vector<128x32xf32>, vector<128x32xf32>, vector<128x128xf32> -> vector<128x128xf32>
    %cst_8 = arith.constant dense<0xFF800000> : vector<128xf32>
    %9 = vector.multi_reduction <maximumf>, %8, %cst_8 [1] : vector<128x128xf32> to vector<128xf32>
    %10 = vector.shape_cast %9 : vector<128xf32> to vector<128x1xf32>
    %11 = vector.broadcast %10 : vector<128x1xf32> to vector<128x128xf32>
    %12 = arith.subf %8, %11 : vector<128x128xf32>
    %13 = math.exp %12 : vector<128x128xf32>
    %cst_9 = arith.constant dense<0.000000e+00> : vector<128xf32>
    %14 = vector.multi_reduction <add>, %13, %cst_9 [1] : vector<128x128xf32> to vector<128xf32>
    %15 = vector.shape_cast %14 : vector<128xf32> to vector<128x1xf32>
    %16 = vector.broadcast %15 : vector<128x1xf32> to vector<128x128xf32>
    %17 = arith.divf %13, %16 : vector<128x128xf32>
    %18 = tpu.transpose %17, [1, 0] : vector<128x128xf32> -> vector<128x128xf32>
    %cst_10 = arith.constant dense<0.000000e+00> : vector<128xf32>
    %19 = vector.multi_reduction <add>, %18, %cst_10 [1] : vector<128x128xf32> to vector<128xf32>
    %20 = vector.shape_cast %19 : vector<128xf32> to vector<128x1xf32>
    %cst_11 = arith.constant 9.99999971E-10 : f32
    %21 = vector.broadcast %cst_11 : f32 to vector<128x1xf32>
    %22 = arith.addf %21, %20 : vector<128x1xf32>
    %23 = vector.broadcast %22 : vector<128x1xf32> to vector<128x128xf32>
    %24 = arith.divf %18, %23 : vector<128x128xf32>
    %c0_12 = arith.constant 0 : index
    %c0_13 = arith.constant 0 : index
    %25 = vector.load %arg4[%c0_12, %c0_13] : memref<128x128xf32, #tpu.memory_space<vmem>>, vector<128x128xf32>
    %cst_14 = arith.constant dense<0.000000e+00> : vector<128x128xf32>
    %26 = tpu.matmul %5, %25, %cst_14 {dimension_numbers = #tpu.dot_dimension_numbers<[1], [0], [0], [1], [0, 0, 1, 1], [], []>} : vector<128x128xf32>, vector<128x128xf32>, vector<128x128xf32> -> vector<128x128xf32>
    %c0_15 = arith.constant 0 : index
    %c0_16 = arith.constant 0 : index
    %27 = vector.load %arg5[%c0_15, %c0_16] : memref<1x128xf32, #tpu.memory_space<vmem>>, vector<1x128xf32>
    %28 = vector.broadcast %27 : vector<1x128xf32> to vector<128x128xf32>
    %29 = arith.addf %26, %28 : vector<128x128xf32>
    %cst_17 = arith.constant dense<0.000000e+00> : vector<128x128xf32>
    %30 = tpu.matmul %24, %29, %cst_17 {dimension_numbers = #tpu.dot_dimension_numbers<[1], [0], [0], [1], [0, 0, 1, 1], [], []>} : vector<128x128xf32>, vector<128x128xf32>, vector<128x128xf32> -> vector<128x128xf32>
    %31 = arith.subf %5, %30 : vector<128x128xf32>
    %c0_18 = arith.constant 0 : index
    %c0_19 = arith.constant 0 : index
    %32 = vector.load %arg6[%c0_18, %c0_19] : memref<128x128xf32, #tpu.memory_space<vmem>>, vector<128x128xf32>
    %cst_20 = arith.constant dense<0.000000e+00> : vector<128x128xf32>
    %33 = tpu.matmul %31, %32, %cst_20 {dimension_numbers = #tpu.dot_dimension_numbers<[1], [0], [0], [1], [0, 0, 1, 1], [], []>} : vector<128x128xf32>, vector<128x128xf32>, vector<128x128xf32> -> vector<128x128xf32>
    %c0_21 = arith.constant 0 : index
    %c0_22 = arith.constant 0 : index
    %34 = vector.load %arg7[%c0_21, %c0_22] : memref<1x128xf32, #tpu.memory_space<vmem>>, vector<1x128xf32>
    %35 = vector.broadcast %34 : vector<1x128xf32> to vector<128x128xf32>
    %36 = arith.addf %33, %35 : vector<128x128xf32>
    %c0_23 = arith.constant 0 : index
    %c0_24 = arith.constant 0 : index
    %37 = vector.load %arg8[%c0_23, %c0_24] : memref<1x128xf32, #tpu.memory_space<vmem>>, vector<1x128xf32>
    %38 = vector.broadcast %37 : vector<1x128xf32> to vector<128x128xf32>
    %39 = arith.mulf %36, %38 : vector<128x128xf32>
    %c0_25 = arith.constant 0 : index
    %c0_26 = arith.constant 0 : index
    %40 = vector.load %arg9[%c0_25, %c0_26] : memref<1x128xf32, #tpu.memory_space<vmem>>, vector<1x128xf32>
    %41 = vector.broadcast %40 : vector<1x128xf32> to vector<128x128xf32>
    %42 = arith.addf %39, %41 : vector<128x128xf32>
    %cst_27 = arith.constant 0.000000e+00 : f32
    %43 = vector.broadcast %cst_27 : f32 to vector<128x128xf32>
    %44 = arith.maximumf %42, %43 : vector<128x128xf32>
    %45 = arith.addf %5, %44 : vector<128x128xf32>
    %46 = tpu.transpose %45, [1, 0] : vector<128x128xf32> -> vector<128x128xf32>
    %c0_28 = arith.constant 0 : index
    %c0_29 = arith.constant 0 : index
    %c0_30 = arith.constant 0 : index
    %47 = vector.load %arg10[%c0_28, %c0_29, %c0_30] : memref<1x128x128xf32, #tpu.memory_space<vmem>>, vector<1x128x128xf32>
    %48 = vector.shape_cast %47 : vector<1x128x128xf32> to vector<128x128xf32>
    %49 = vector.shape_cast %46 : vector<128x128xf32> to vector<1x128x128xf32>
    tpu.vector_store %arg10[%c0_28, %c0_29, %c0_30], %49 {strides = array<i32>} : memref<1x128x128xf32, #tpu.memory_space<vmem>>, vector<1x128x128xf32>,
    return
  }
  func.func @transform_0(%arg0: i32) -> (i32, i32, i32) {
    %c0_i32 = arith.constant 0 : i32
    %c0_i32_0 = arith.constant 0 : i32
    %c0_i32_1 = arith.constant 0 : i32
    return %arg0, %c0_i32, %c0_i32_0 : i32, i32, i32
  }
  func.func @transform_1(%arg0: i32) -> (i32, i32, i32) {
    %c0_i32 = arith.constant 0 : i32
    %c0_i32_0 = arith.constant 0 : i32
    %c0_i32_1 = arith.constant 0 : i32
    return %arg0, %c0_i32, %c0_i32_0 : i32, i32, i32
  }
  func.func @transform_2(%arg0: i32) -> (i32, i32) {
    %c0_i32 = arith.constant 0 : i32
    %c0_i32_0 = arith.constant 0 : i32
    %c0_i32_1 = arith.constant 0 : i32
    return %c0_i32, %c0_i32_0 : i32, i32
  }
  func.func @transform_3(%arg0: i32) -> (i32, i32) {
    %c0_i32 = arith.constant 0 : i32
    %c0_i32_0 = arith.constant 0 : i32
    %c0_i32_1 = arith.constant 0 : i32
    return %c0_i32, %c0_i32_0 : i32, i32
  }
  func.func @transform_4(%arg0: i32) -> (i32, i32) {
    %c0_i32 = arith.constant 0 : i32
    %c0_i32_0 = arith.constant 0 : i32
    %c0_i32_1 = arith.constant 0 : i32
    return %c0_i32, %c0_i32_0 : i32, i32
  }
  func.func @transform_5(%arg0: i32) -> (i32, i32) {
    %c0_i32 = arith.constant 0 : i32
    %c0_i32_0 = arith.constant 0 : i32
    %c0_i32_1 = arith.constant 0 : i32
    return %c0_i32, %c0_i32_0 : i32, i32
  }
  func.func @transform_6(%arg0: i32) -> (i32, i32) {
    %c0_i32 = arith.constant 0 : i32
    %c0_i32_0 = arith.constant 0 : i32
    %c0_i32_1 = arith.constant 0 : i32
    return %c0_i32, %c0_i32_0 : i32, i32
  }
  func.func @transform_7(%arg0: i32) -> (i32, i32) {
    %c0_i32 = arith.constant 0 : i32
    %c0_i32_0 = arith.constant 0 : i32
    %c0_i32_1 = arith.constant 0 : i32
    return %c0_i32, %c0_i32_0 : i32, i32
  }
  func.func @transform_8(%arg0: i32) -> (i32, i32) {
    %c0_i32 = arith.constant 0 : i32
    %c0_i32_0 = arith.constant 0 : i32
    %c0_i32_1 = arith.constant 0 : i32
    return %c0_i32, %c0_i32_0 : i32, i32
  }
  func.func @transform_9(%arg0: i32) -> (i32, i32, i32) {
    %c0_i32 = arith.constant 0 : i32
    %c0_i32_0 = arith.constant 0 : i32
    %c0_i32_1 = arith.constant 0 : i32
    return %arg0, %c0_i32, %c0_i32_0 : i32, i32, i32
  }
}

</mosaic_0001>

<bundles_post_ra>
// kernel: tpu_custom_call.1
= control target key start
LH: loop header
LB: loop body
LE: loop exit
PB: predicated region body
PF: predicated region fallthrough
CT: control target
= control target key end

     0   :  { %s3732_s0 = inlined_call_operand.hbm [shape: f32[2,128,128], index: 0, kind: input, shape index: {}]   ;;  %s3733_s1 = inlined_call_operand.hbm [shape: f32[2,128,128], index: 1, kind: input, shape index: {}]   ;;  %s3734_s2 = inlined_call_operand.vmem [shape: f32[128,32], index: 2, kind: input, shape index: {}]   ;;  %s3735_s3 = inlined_call_operand.vmem [shape: f32[128,128], index: 3, kind: input, shape index: {}]   ;;  %s3736_s4 = inlined_call_operand.vmem [shape: f32[1,128], index: 4, kind: input, shape index: {}]   ;;  %s3737_s5 = inlined_call_operand.hbm [shape: f32[128,128], index: 5, kind: input, shape index: {}]   ;;  %s3738_s6 = inlined_call_operand.vmem [shape: f32[1,128], index: 6, kind: input, shape index: {}]   ;;  %s3739_s7 = inlined_call_operand.vmem [shape: f32[1,128], index: 7, kind: input, shape index: {}]   ;;  %s3740_s8 = inlined_call_operand.vmem [shape: f32[1,128], index: 8, kind: input, shape index: {}]   ;;  %s3741_s9 = inlined_call_operand.hbm [shape: f32[2,128,128], index: 9, kind: output, shape index: {}]  }
   0x1   :  { %3755 = sst [smem:[#allocation18_spill]] %s3732_s0 }
   0x2   :  { %3756 = sst [smem:[#allocation19_spill]] %s3737_s5 }
   0x3   :  { %3757 = sst [smem:[#allocation20_spill]] %s3741_s9 }
   0x4   :  { %14 = vsyncpa [#allocation3], 0 }
   0x5   :  { %16 = vsyncpa [#allocation3 + $0x1], 0 }
   0x6   :  { %17 = vsyncpa [#allocation6], 0 }
   0x7   :  { %19 = vsyncpa [#allocation6 + $0x1], 0 }
   0x8   :  { %20 = vsyncpa [#allocation4], 0 }
   0x9   :  { %22 = vsyncpa [#allocation4 + $0x1], 0  ;;  %s2897_s30 = smov 0   ;;  %s2899_s10 = smov 0  }
   0xa   :  { %s2901_s11 = smov 0   ;;  %s2903_s12 = smov 0  }
   0xb LB: > { %3758 = sst [smem:[#allocation13_spill]] %s2825_s30  ;;  %s2918_s13 = sadd.s32 4294967295, %s2837_s12   ;;  %s2837_s12 = sphi %s2903_s12, %s3785_s12   ;;  %s2833_s11 = sphi %s2901_s11, %s3787_s11   ;;  %s2829_s10 = sphi %s2899_s10, %s3789_s10   ;;  %s2825_s30 = sphi %s2897_s30, %s3788_s30  }
   0xc   : > { %3759 = sst [smem:[#allocation14_spill]] %s2833_s11  ;;  %s1838_s14 = sadd.s32 4294967294, %s2837_s12  }
   0xd   : > { %p48_p0 = scmp.ne.s32.totalorder %s2829_s10, %s2825_s30  ;;  %p3742_p1 = scmp.eq.s32.totalorder %s2918_s13, 0 }
   0xe   : > { %p251_p3 = scmp.eq.s32.totalorder %s1838_s14, 1  ;;  %p1839_p5 = scmp.ge.s32.totalorder %s2837_s12, 1 }
   0xf   : > { %p2927_p4 = por %p3742_p1, %p48_p0  ;;  %p258_p7 = scmp.lt.s32.totalorder %s2837_s12, 3 }
  0x10   : > { %p2932_p6 = por %p251_p3, %p48_p0  ;;  %s2839_s18 = smov [#allocation7]  }
  0x11   : > { %s3760_s15 = scalar_select %p2927_p4, 1, 0 }
  0x12   : > { %s3761_s16 = scalar_select %p2932_p6, 1, 0 }
  0x13   : > { %p2937_p8 = pnand %p1839_p5, %p258_p7  ;;  %s279_s19 = sshll.u32 %s2839_s18, 4  ;;  %s2941_s19 = int_to_ptr.vmem [resolvable:$true] %s279_s19 }
  0x14   : > { %3762 = sst [smem:[#allocation15_spill]] %s3761_s16  ;;  %s2953_s21 = sadd.s32 1, %s2837_s12  }
  0x15   : > { %s3763_s17 = scalar_select %p2937_p8, 1, 0 }
  0x16   : > { %p2523_p9 = pneg %p2937_p8  ;;  %3765 = sst [smem:[#allocation16_spill]] %s2953_s21 }
  0x17   : > { %s35_s22 = sadd.s32 1, %s2833_s11  ;;  %s32_s23 = ssub.s32 %s2837_s12, %s2953_s21 }
  0x18   : > { %p2948_p11 = pnand %p2523_p9, %p3742_p1  ;;  %s3766_s5 = sld [smem:[#allocation19_spill]] }
  0x1a   : > { %p2677_p13 = pneg %p2948_p11 }
  0x1e   : > { %s2675_s26 = scalar_lea.hbm %s3766_s5, 2048 }
  0x1f   : > { %p2676_p12 = scmp.ne.s32.totalorder %s3766_s5, %s2675_s26  ;;  %p2682_p5 = scmp.lt.u32.totalorder %s2675_s26, %s3766_s5 }
  0x21   : > { %p2678_p0 = pnand %p2677_p13, %p2676_p12 }
  0x23   : > { %p2679_p3 = pneg %p2678_p0 }
  0x25   : > { %p2684_p7 = pnand %p2682_p5, %p2679_p3 }
  0x27   : > { %2687 = shalt.err (!%p2684_p7)
}
  0x28   : > { %s2688_s18 = scalar_lea.vmem %s2941_s19, 2048  ;;  %p2696_p2 = scmp.lt.s32.totalorder %s2941_s19, %s2941_s19 }
  0x29   : > { %p2689_p9 = scmp.ne.s32.totalorder %s2941_s19, %s2688_s18  ;;  %p2697_p6 = scmp.lt.s32.totalorder %s2688_s18, %s2688_s18 }
  0x2b   : > { %p2691_p10 = pnand %p2689_p9, %p2677_p13  ;;  %p2698_p4 = por %p2697_p6, %p2696_p2 }
  0x2d   : > { %p2692_p1 = pneg %p2691_p10 }
  0x2f   : > { %p2699_p8 = pnand %p2698_p4, %p2692_p1 }
  0x31   : > { %2702 = shalt.err (!%p2699_p8)
}
  0x32   : > { %s3748_s24 = smov 128   ;;  %s3750_s25 = smov 8  }
  0x33   : > { %2526 = dma.hbm_to_vmem [thread:$0]  (!%p2948_p11), %s3766_s5, 2048, %s2941_s19, [#allocation6], %s3748_s24, %s3748_s24, %s3750_s25  }
  0x34   : > { %p33_p1 = scmp.eq.s32.totalorder %s32_s23, 0  ;;  %p42_p2 = scmp.ne.s32.totalorder %s2833_s11, %s2829_s10 }
  0x35   : > { %p43_p4 = scmp.eq.s32.totalorder %s2837_s12, 0  ;;  %p2539_p6 = scmp.lt.s32.totalorder %s2837_s12, 2 }
  0x36   : > { %s2987_s28 = scalar_select %p33_p1, %s2833_s11, %s35_s22  }
  0x37   : > { %p44_p8 = por %p43_p4, %p42_p2  ;;  %p3768_p10 = scmp.eq.s32.totalorder %s2918_s13, 1 }
  0x38   : > { %3767 = sst [smem:[#allocation17_spill]] %s2987_s28  ;;  %s302_s20 = sand.u32 1, %s2833_s11  }
  0x39   : > { %p2991_p12 = por %p3768_p10, %p42_p2  ;;  %s1894_s14 = sshll.u32 %s2837_s12, 11 }
  0x3a   : > { %s2997_s18 = sshll.u32 %s302_s20, 7  ;;  %s3770_s0 = sld [smem:[#allocation18_spill]] }
  0x3b   : > { %s306_s22 = scalar_lea.vmem [#allocation2], %s2997_s18  ;;  %p3005_p11 = pnand %p2539_p6, %p44_p8 }
  0x3c   : > { %s313_s23 = sshll.u32 %s306_s22, 4  ;;  %s3014_s16 = scalar_lea.hbm %s3733_s1, %s1894_s14  ;;  %s3009_s23 = int_to_ptr.vmem [resolvable:$true] %s313_s23 }
  0x3d   : > { %s3016_s21 = scalar_lea.sflag [#allocation3], %s302_s20  ;;  %p2705_p0 = pneg %p3005_p11 }
  0x40   : > { %s3002_s19 = scalar_lea.hbm %s3770_s0, %s1894_s14  ;;  %s2708_s28 = scalar_lea.hbm %s3770_s0, 4096 }
  0x41   : > { %s2703_s25 = scalar_lea.hbm %s3002_s19, 2048  ;;  %p2709_p7 = scmp.lt.u32.totalorder %s3002_s19, %s3770_s0 }
  0x42   : > { %p2704_p13 = scmp.ne.s32.totalorder %s3002_s19, %s2703_s25  ;;  %p2710_p9 = scmp.lt.u32.totalorder %s2708_s28, %s2703_s25 }
  0x43   : > { %p2712_p2 = scmp.lt.u32.totalorder %s2703_s25, %s3002_s19 }
  0x44   : > { %p2706_p3 = pnand %p2705_p0, %p2704_p13  ;;  %p2711_p1 = por %p2710_p9, %p2709_p7 }
  0x46   : > { %p2707_p5 = pneg %p2706_p3  ;;  %p2713_p4 = por %p2712_p2, %p2711_p1 }
  0x48   : > { %p2714_p6 = pnand %p2713_p4, %p2707_p5 }
  0x4a   : > { %2717 = shalt.err (!%p2714_p6)
}
  0x4b   : > { %s2718_s24 = scalar_lea.vmem %s3009_s23, 2048  ;;  %s2842_s5 = smov [#allocation2]  }
  0x4c   : > { %p2719_p8 = scmp.ne.s32.totalorder %s3009_s23, %s2718_s24  ;;  %s2723_s20 = sshll.u32 %s2842_s5, 4  ;;  %s2724_s20 = int_to_ptr.vmem [resolvable:$false] %s2723_s20 }
  0x4d   : > { %s2725_s30 = scalar_lea.vmem %s2724_s20, 4096  ;;  %p2726_p3 = scmp.lt.s32.totalorder %s3009_s23, %s2724_s20 }
  0x4e   : > { %p2721_p10 = pnand %p2719_p8, %p2705_p0  ;;  %p2727_p7 = scmp.lt.s32.totalorder %s2725_s30, %s2718_s24 }
  0x50   : > { %p2722_p13 = pneg %p2721_p10  ;;  %p2728_p9 = por %p2727_p7, %p2726_p3 }
  0x52   : > { %p2729_p1 = pnand %p2728_p9, %p2722_p13 }
  0x54   : > { %2732 = shalt.err (!%p2729_p1)
}
  0x55   : > { %s3772_s11 = smov 8   ;;  %s3773_s25 = smov 128  }
  0x56   : > { %2530 = dma.hbm_to_vmem [thread:$0]  (!%p3005_p11), %s3002_s19, 2048, %s3009_s23, %s3016_s21, %s3773_s25, %s3773_s25, %s3772_s11  }
  0x57   : > { %s327_s28 = scalar_lea.vmem [#allocation5], %s2997_s18  ;;  %s323_s27 = sand.u32 1, %s2837_s12  }
  0x58   : > { %s334_s14 = sshll.u32 %s327_s28, 4  ;;  %s3051_s22 = scalar_lea.sflag [#allocation6], %s323_s27  ;;  %s3049_s14 = int_to_ptr.vmem [resolvable:$true] %s334_s14 }
  0x59   : > { %s2733_s24 = scalar_lea.hbm %s3014_s16, 2048  ;;  %s2738_s30 = scalar_lea.hbm %s3733_s1, 4096 }
  0x5a   : > { %p2734_p5 = scmp.ne.s32.totalorder %s3014_s16, %s2733_s24  ;;  %p2739_p6 = scmp.lt.u32.totalorder %s3014_s16, %s3733_s1 }
  0x5b   : > { %p2740_p8 = scmp.lt.u32.totalorder %s2738_s30, %s2733_s24  ;;  %p2742_p13 = scmp.lt.u32.totalorder %s2733_s24, %s3014_s16 }
  0x5c   : > { %p2736_p2 = pnand %p2734_p5, %p2705_p0 }
  0x5d   : > { %p2741_p10 = por %p2740_p8, %p2739_p6 }
  0x5e   : > { %p2737_p4 = pneg %p2736_p2 }
  0x5f   : > { %p2743_p3 = por %p2742_p13, %p2741_p10 }
  0x61   : > { %p2744_p7 = pnand %p2743_p3, %p2737_p4 }
  0x63   : > { %2747 = shalt.err (!%p2744_p7)
}
  0x64   : > { %s2748_s18 = scalar_lea.vmem %s3049_s14, 2048  ;;  %s2843_s19 = smov [#allocation5]  }
  0x65   : > { %p2749_p9 = scmp.ne.s32.totalorder %s3049_s14, %s2748_s18  ;;  %s2753_s23 = sshll.u32 %s2843_s19, 4  ;;  %s2754_s23 = int_to_ptr.vmem [resolvable:$false] %s2753_s23 }
  0x66   : > { %s2755_s0 = scalar_lea.vmem %s2754_s23, 4096  ;;  %p2756_p2 = scmp.lt.s32.totalorder %s3049_s14, %s2754_s23 }
  0x67   : > { %p2751_p1 = pnand %p2749_p9, %p2705_p0  ;;  %p2757_p6 = scmp.lt.s32.totalorder %s2755_s0, %s2748_s18 }
  0x69   : > { %p2752_p5 = pneg %p2751_p1  ;;  %p2758_p8 = por %p2757_p6, %p2756_p2 }
  0x6b   : > { %p2759_p10 = pnand %p2758_p8, %p2752_p5 }
  0x6d   : > { %2762 = shalt.err (!%p2759_p10)
}
  0x6e   : > { %2533 = dma.hbm_to_vmem [thread:$0]  (!%p3005_p11), %s3014_s16, 2048, %s3049_s14, %s3051_s22, %s3773_s25, %s3773_s25, %s3772_s11  }
  0x6f   : > { %p3774_p0 = scmp.ne.s32.totalorder %s3763_s17, 0 }
  0x70   : > { %s3083_s9 = sand.u32 (!%p3774_p0), 1, %s2829_s10   ;;  %p3775_p4 = scmp.ne.s32.totalorder (!%p3774_p0), %s3760_s15, 0 }
  0x71   : > { %346 = sbr.rel (%p3774_p0) target bundleno = 2004 (0x7d4), region = 56  ;;  %s3086_s21 = sshll.u32 (!%p3774_p0), %s3083_s9, 7 }
  0x72   : > { %s349_s26 = scalar_lea.sflag (!%p3774_p0), [#allocation3], %s3083_s9  ;;  %s3090_s28 = scalar_lea.vmem (!%p3774_p0), [#allocation2], %s3086_s21 }
  0x78   : > { %2808 = dma.done.wait (%p3775_p4), %s349_s26, 2048  }
  0x79   : > { %2810 = vsyncadd (%p3775_p4), %s349_s26, 4294965248  ;;  %s357_s17 = sand.u32 1, %s2918_s13   ;;  %s3098_s11 = scalar_lea.vmem [#allocation5], %s3086_s21 }
  0x7a   : > { %s358_s16 = scalar_lea.sflag [#allocation6], %s357_s17 }
  0x7b   : > { %2812 = dma.done.wait (%p3775_p4), %s358_s16, 2048  }
  0x7c   : > { %2814 = vsyncadd (%p3775_p4), %s358_s16, 4294965248  ;;  %p3776_p11 = scmp.eq.s32.totalorder %s2918_s13, 0 }
  0x7e   : > { %2816 = dma.done.wait (%p3776_p11), [#allocation6], 2048   ;;  %p3777_p13 = pmov %p3776_p11 }
  0x7f   : > { %v405_v0 = vld [vmem:[%s3090_s28] sm:$0xff]  ;;  %v406_v2 = vld [vmem:[%s3090_s28 + $0x8] sm:$0xff]  ;;  %v407_v6 = vld [vmem:[%s3090_s28 + $0x10] sm:$0xff]  ;;  %vm646_vm0 = vcmask 261120   ;;  %s3663_s22 = scalar_lea.vmem [#allocation8], %s3086_s21  ;;  %s1896_s21 = sshll.u32 %s2918_s13, 11 }
  0x80   : > { %2818 = vsyncadd (%p3777_p13), [#allocation6], 4294965248  ;;  %v421_v1 = vld [vmem:[%s3098_s11] sm:$0xff]  ;;  %v422_v4 = vld [vmem:[%s3098_s11 + $0x8] sm:$0xff]  ;;  %s1733_s24 = sshll.u32 %s3663_s22, 4  ;;  %s1720_s30 = scalar_lea.sflag [#allocation4], %s3083_s9  ;;  %s3687_s24 = int_to_ptr.vmem [resolvable:$true] %s1733_s24 }
  0x81   : > { %v437_v3 = vadd.f32 %v421_v1, %v405_v0  ;;  %v438_v5 = vadd.f32 %v422_v4, %v406_v2  ;;  %v423_v7 = vld [vmem:[%s3098_s11 + $0x10] sm:$0xff]  ;;  %v408_v9 = vld [vmem:[%s3090_s28 + $0x18] sm:$0xff]  ;;  %v485_v11 = vld [vmem:[%s3734_s2] sm:$0xff]  ;;  %s2763_s18 = scalar_lea.vmem %s3687_s24, 2048  ;;  %s2844_s13 = smov [#allocation8]  }
  0x82   : > { %v439_v8 = vadd.f32 %v423_v7, %v407_v6  ;;  %v424_v10 = vld [vmem:[%s3098_s11 + $0x18] sm:$0xff]  ;;  %v486_v13 = vld [vmem:[%s3734_s2 + $0x8] sm:$0xff]  ;;  %v487_v14 = vld [vmem:[%s3734_s2 + $0x10] sm:$0xff]  ;;  %p2764_p3 = scmp.ne.s32.totalorder %s3687_s24, %s2763_s18  ;;  %s2767_s19 = sshll.u32 %s2844_s13, 4  ;;  %s2768_s19 = int_to_ptr.vmem [resolvable:$false] %s2767_s19 }
  0x83   : > { %453 = vxpose.xlu0.b32.start [1/16] %v437_v3, 128  ;;  %v440_v12 = vadd.f32 %v424_v10, %v408_v9  ;;  %v488_v15 = vld [vmem:[%s3734_s2 + $0x18] sm:$0xff]  ;;  %v409_v16 = vld [vmem:[%s3090_s28 + $0x20] sm:$0xff]  ;;  %v2337_v18 = vpack.c.bf16 %v486_v13, %v485_v11  ;;  %v490_v21 = vld [vmem:[%s3734_s2 + $0x28] sm:$0xff]  ;;  %s2769_s23 = scalar_lea.vmem %s2768_s19, 4096  ;;  %p2770_p1 = scmp.lt.s32.totalorder %s3687_s24, %s2768_s19 }
  0x84   : > { %v425_v17 = vld [vmem:[%s3098_s11 + $0x20] sm:$0xff]  ;;  %v2341_v19 = vpack.c.bf16 %v488_v15, %v487_v14  ;;  %v410_v23 = vld [vmem:[%s3090_s28 + $0x28] sm:$0xff]  ;;  %v491_v26 = vld [vmem:[%s3734_s2 + $0x30] sm:$0xff]  ;;  %p2765_p7 = pnand %p2764_p3, %p2991_p12  ;;  %p2771_p5 = scmp.lt.s32.totalorder %s2769_s23, %s2763_s18 }
  0x85   : > { %v489_v20 = vld [vmem:[%s3734_s2 + $0x20] sm:$0xff]  ;;  %2338 = vmatprep.subr.bf16.mxu0 %v2337_v18  ;;  %v441_v22 = vadd.f32 %v425_v17, %v409_v16  ;;  %v426_v24 = vld [vmem:[%s3098_s11 + $0x28] sm:$0xff]  ;;  %v492_v27 = vld [vmem:[%s3734_s2 + $0x38] sm:$0xff] }
  0x86   : > { %2340 = vmatpush3.bf16.msra.mxu0 %v2337_v18  ;;  %v2345_v25 = vpack.c.bf16 %v490_v21, %v489_v20  ;;  %v442_v28 = vadd.f32 %v426_v24, %v410_v23  ;;  %v411_v29 = vld [vmem:[%s3090_s28 + $0x30] sm:$0xff]  ;;  %v2349_v31 = vpack.c.bf16 %v492_v27, %v491_v26  ;;  %v493_v32 = vld [vmem:[%s3734_s2 + $0x40] sm:$0xff]  ;;  %v494_v33 = vld [vmem:[%s3734_s2 + $0x48] sm:$0xff]  ;;  %p2766_p9 = pneg %p2765_p7  ;;  %p2772_p2 = por %p2771_p5, %p2770_p1 }
  0x87   : > { %454 = vxpose.xlu0.b32.cont [2/16] %v438_v5, 128  ;;  %2342 = vmatprep.subr.bf16.mxu0 %v2341_v19  ;;  %v427_v30 = vld [vmem:[%s3098_s11 + $0x30] sm:$0xff]  ;;  %v412_v35 = vld [vmem:[%s3090_s28 + $0x38] sm:$0xff]  ;;  %v2353_v37 = vpack.c.bf16 %v494_v33, %v493_v32  ;;  %v413_v41 = vld [vmem:[%s3090_s28 + $0x40] sm:$0xff] }
  0x88   : > { %v443_v34 = vadd.f32 %v427_v30, %v411_v29  ;;  %v428_v36 = vld [vmem:[%s3098_s11 + $0x38] sm:$0xff]  ;;  %v495_v38 = vld [vmem:[%s3734_s2 + $0x50] sm:$0xff]  ;;  %v429_v42 = vld [vmem:[%s3098_s11 + $0x40] sm:$0xff]  ;;  %p2773_p6 = pnand %p2772_p2, %p2766_p9 }
  0x89   : > { %v496_v39 = vld [vmem:[%s3734_s2 + $0x58] sm:$0xff]  ;;  %v444_v40 = vadd.f32 %v428_v36, %v412_v35  ;;  %v497_v44 = vld [vmem:[%s3734_s2 + $0x60] sm:$0xff]  ;;  %v498_v45 = vld [vmem:[%s3734_s2 + $0x68] sm:$0xff]  ;;  %v445_v46 = vadd.f32 %v429_v42, %v413_v41 }
  0x8a   : > { %2344 = vmatpush3.bf16.msra.mxu0 %v2341_v19  ;;  %v2357_v43 = vpack.c.bf16 %v496_v39, %v495_v38  ;;  %v414_v47 = vld [vmem:[%s3090_s28 + $0x48] sm:$0xff]  ;;  %v2361_v49 = vpack.c.bf16 %v498_v45, %v497_v44  ;;  %v499_v50 = vld [vmem:[%s3734_s2 + $0x70] sm:$0xff]  ;;  %v500_v51 = vld [vmem:[%s3734_s2 + $0x78] sm:$0xff] }
  0x8b   : > { %455 = vxpose.xlu0.b32.cont [3/16] %v439_v8, 128  ;;  %2346 = vmatprep.subr.bf16.mxu0 %v2345_v25  ;;  %v430_v48 = vld [vmem:[%s3098_s11 + $0x48] sm:$0xff]  ;;  %v415_v53 = vld [vmem:[%s3090_s28 + $0x50] sm:$0xff]  ;;  %v2365_v55 = vpack.c.bf16 %v500_v51, %v499_v50  ;;  %v1096_v56 = vld [vmem:[%s3735_s3] sm:$0xff] }
  0x8c   : > { %v446_v52 = vadd.f32 %v430_v48, %v414_v47  ;;  %v431_v54 = vld [vmem:[%s3098_s11 + $0x50] sm:$0xff]  ;;  %v1097_v57 = vld [vmem:[%s3735_s3 + $0x8] sm:$0xff]  ;;  %v416_v59 = vld [vmem:[%s3090_s28 + $0x58] sm:$0xff] }
  0x8d   : > { %v447_v58 = vadd.f32 %v431_v54, %v415_v53  ;;  %v432_v60 = vld [vmem:[%s3098_s11 + $0x58] sm:$0xff]  ;;  %v2417_v61 = vpack.c.bf16 %v1097_v57, %v1096_v56  ;;  %v417_v63 = vld [vmem:[%s3090_s28 + $0x60] sm:$0xff]  ;;  %v418_v2 = vld [vmem:[%s3090_s28 + $0x68] sm:$0xff] }
  0x8e   : > { %2348 = vmatpush3.bf16.msra.mxu0 %v2345_v25  ;;  %v448_v62 = vadd.f32 %v432_v60, %v416_v59  ;;  %v433_v0 = vld [vmem:[%s3098_s11 + $0x60] sm:$0xff]  ;;  %v434_v3 = vld [vmem:[%s3098_s11 + $0x68] sm:$0xff]  ;;  %v419_v5 = vld [vmem:[%s3090_s28 + $0x70] sm:$0xff] }
  0x8f   : > { %456 = vxpose.xlu0.b32.cont [4/16] %v440_v12, 128  ;;  %2350 = vmatprep.subr.bf16.mxu0 %v2349_v31  ;;  %v449_v1 = vadd.f32 %v433_v0, %v417_v63  ;;  %v450_v4 = vadd.f32 %v434_v3, %v418_v2  ;;  %v435_v6 = vld [vmem:[%s3098_s11 + $0x70] sm:$0xff]  ;;  %v420_v8 = vld [vmem:[%s3090_s28 + $0x78] sm:$0xff]  ;;  %v1100_v16 = vld [vmem:[%s3735_s3 + $0x20] sm:$0xff]  ;;  %s3780_s28 = sld [smem:[#allocation20_spill]] }
  0x90   : > { %v451_v7 = vadd.f32 %v435_v6, %v419_v5  ;;  %v436_v9 = vld [vmem:[%s3098_s11 + $0x78] sm:$0xff]  ;;  %v1098_v12 = vld [vmem:[%s3735_s3 + $0x10] sm:$0xff]  ;;  %v1101_v17 = vld [vmem:[%s3735_s3 + $0x28] sm:$0xff] }
  0x91   : > { %v452_v10 = vadd.f32 %v436_v9, %v420_v8  ;;  %v1099_v13 = vld [vmem:[%s3735_s3 + $0x18] sm:$0xff]  ;;  %v2425_v18 = vpack.c.bf16 %v1101_v17, %v1100_v16  ;;  %v1102_v20 = vld [vmem:[%s3735_s3 + $0x30] sm:$0xff]  ;;  %v1104_v24 = vld [vmem:[%s3735_s3 + $0x40] sm:$0xff] }
  0x92   : > { %2352 = vmatpush3.bf16.msra.mxu0 %v2349_v31  ;;  %v2421_v14 = vpack.c.bf16 %v1099_v13, %v1098_v12  ;;  %v1103_v21 = vld [vmem:[%s3735_s3 + $0x38] sm:$0xff]  ;;  %v1105_v25 = vld [vmem:[%s3735_s3 + $0x48] sm:$0xff]  ;;  %v1108_v32 = vld [vmem:[%s3735_s3 + $0x60] sm:$0xff] }
  0x93   : > { %457 = vxpose.xlu0.b32.cont [5/16] %v441_v22, 128  ;;  %2354 = vmatprep.subr.bf16.mxu0 %v2353_v37  ;;  %v2429_v22 = vpack.c.bf16 %v1103_v21, %v1102_v20  ;;  %v2433_v26 = vpack.c.bf16 %v1105_v25, %v1104_v24  ;;  %v1107_v29 = vld [vmem:[%s3735_s3 + $0x58] sm:$0xff]  ;;  %v1109_v33 = vld [vmem:[%s3735_s3 + $0x68] sm:$0xff]  ;;  %v1110_v36 = vld [vmem:[%s3735_s3 + $0x70] sm:$0xff] }
  0x94   : > { %vm3302_vm1 = vmpackc.low %vm646_vm0, %vm646_vm0  ;;  %v3362_v9 = vld [vmem:[%s3736_s4] ss:$0 sm:$0xff] }
  0x95   : > { %s3685_s11 = scalar_lea.hbm %s3780_s28, %s1896_s21 }
  0x96   : > { %2356 = vmatpush3.bf16.msra.mxu0 %v2353_v37  ;;  %v1111_v37 = vld [vmem:[%s3735_s3 + $0x78] sm:$0xff] }
  0x97   : > { %458 = vxpose.xlu0.b32.cont [6/16] %v442_v28, 128  ;;  %2358 = vmatprep.subr.bf16.mxu0 %v2357_v43  ;;  %v1106_v28 = vld [vmem:[%s3735_s3 + $0x50] sm:$0xff]  ;;  %v2445_v38 = vpack.c.bf16 %v1111_v37, %v1110_v36 }
  0x98   : > { %v2437_v30 = vpack.c.bf16 %v1107_v29, %v1106_v28 }
  0x9a   : > { %2360 = vmatpush3.bf16.msra.mxu0 %v2357_v43 }
  0x9b   : > { %459 = vxpose.xlu0.b32.cont [7/16] %v443_v34, 128  ;;  %2362 = vmatprep.subr.bf16.mxu0 %v2361_v49  ;;  %v2441_v34 = vpack.c.bf16 %v1109_v33, %v1108_v32 }
  0x9e   : > { %2364 = vmatpush3.bf16.msra.mxu0 %v2361_v49 }
  0x9f   : > { %460 = vxpose.xlu0.b32.cont [8/16] %v444_v40, 128  ;;  %2366 = vmatprep.subr.bf16.mxu0 %v2365_v55 }
  0xa2   : > { %2368 = vmatpush3.bf16.msra.mxu0 %v2365_v55 }
  0xa3   : > { %461 = vxpose.xlu0.b32.cont [9/16] %v445_v46, 128  ;;  %2418 = vmatprep.subr.bf16.mxu0 %v2417_v61 }
  0xa7   : > { %462 = vxpose.xlu0.b32.cont [10/16] %v446_v52, 128 }
  0xab   : > { %463 = vxpose.xlu0.b32.cont [11/16] %v447_v58, 128 }
  0xaf   : > { %464 = vxpose.xlu0.b32.cont [12/16] %v448_v62, 128 }
  0xb3   : > { %465 = vxpose.xlu0.b32.cont [13/16] %v449_v1, 128 }
  0xb7   : > { %466 = vxpose.xlu0.b32.cont [14/16] %v450_v4, 128 }
  0xbb   : > { %467 = vxpose.xlu0.b32.cont [15/16] %v451_v7, 128 }
  0xbf   : > { %468 = vxpose.xlu0.b32.end [16/16] %v452_v10, 128 }
 0x103   : > { %v3194_v11 = vpop.trf.xlu0 }
 0x104   : > { %2089 = vmatprep.mubr.f32.mxu0 %v3194_v11 }
 0x107   : > { %v3203_v15 = vpop.trf.xlu0 }
 0x108   : > { %2090 = vmatmul.mubr.f32.vlgmr.msra.gmra.mrb[0].mxu0 %v3203_v15 }
 0x109   : > { %2420 = vmatpush3.bf16.msra.mxu0 %v2417_v61 }
 0x10a   : > { %2422 = vmatprep.subr.bf16.mxu0 %v2421_v14 }
 0x10b   : > { %v3212_v19 = vpop.trf.xlu0 }
 0x10c   : > { %2092 = vmatprep.mubr.f32.mxu0 %v3212_v19 }
 0x10d   : > { %2424 = vmatpush3.bf16.msra.mxu0 %v2421_v14 }
 0x10e   : > { %2426 = vmatprep.subr.bf16.mxu0 %v2425_v18 }
 0x10f   : > { %v3221_v23 = vpop.trf.xlu0 }
 0x110   : > { %2093 = vmatmul.mubr.f32.gmra.mrb[2].mxu0 %v3221_v23 }
 0x111   : > { %2428 = vmatpush3.bf16.msra.mxu0 %v2425_v18 }
 0x112   : > { %2430 = vmatprep.subr.bf16.mxu0 %v2429_v22 }
 0x113   : > { %v3230_v27 = vpop.trf.xlu0 }
 0x114   : > { %2095 = vmatprep.mubr.f32.mxu0 %v3230_v27 }
 0x115   : > { %2432 = vmatpush3.bf16.msra.mxu0 %v2429_v22 }
 0x116   : > { %2434 = vmatprep.subr.bf16.mxu0 %v2433_v26 }
 0x117   : > { %v3239_v31 = vpop.trf.xlu0 }
 0x118   : > { %2096 = vmatmul.mubr.f32.gmra.mrb[4].mxu0 %v3239_v31 }
 0x119   : > { %2436 = vmatpush3.bf16.msra.mxu0 %v2433_v26 }
 0x11a   : > { %2438 = vmatprep.subr.bf16.mxu0 %v2437_v30 }
 0x11b   : > { %v3248_v35 = vpop.trf.xlu0 }
 0x11c   : > { %2098 = vmatprep.mubr.f32.mxu0 %v3248_v35 }
 0x11d   : > { %2440 = vmatpush3.bf16.msra.mxu0 %v2437_v30 }
 0x11e   : > { %2442 = vmatprep.subr.bf16.mxu0 %v2441_v34 }
 0x11f   : > { %v3257_v39 = vpop.trf.xlu0 }
 0x120   : > { %2099 = vmatmul.mubr.f32.gmra.mrb[6].mxu0 %v3257_v39 }
 0x121   : > { %2444 = vmatpush3.bf16.msra.mxu0 %v2441_v34 }
 0x122   : > { %2446 = vmatprep.subr.bf16.mxu0 %v2445_v38 }
 0x123   : > { %v3260_v40 = vpop.trf.xlu0 }
 0x124   : > { %2101 = vmatprep.mubr.f32.mxu0 %v3260_v40 }
 0x125   : > { %2448 = vmatpush3.bf16.msra.mxu0 %v2445_v38 }
 0x127   : > { %v3263_v41 = vpop.trf.xlu0 }
 0x128   : > { %2102 = vmatmul.mubr.f32.gmra.mrb[8].mxu0 %v3263_v41 }
 0x12b   : > { %v3266_v42 = vpop.trf.xlu0 }
 0x12c   : > { %2104 = vmatprep.mubr.f32.mxu0 %v3266_v42 }
 0x12f   : > { %v3269_v43 = vpop.trf.xlu0 }
 0x130   : > { %2105 = vmatmul.mubr.f32.gmra.mrb[10].mxu0 %v3269_v43 }
 0x133   : > { %v3272_v44 = vpop.trf.xlu0 }
 0x134   : > { %2107 = vmatprep.mubr.f32.mxu0 %v3272_v44 }
 0x137   : > { %v3275_v45 = vpop.trf.xlu0 }
 0x138   : > { %2108 = vmatmul.mubr.f32.gmra.mrb[12].mxu0 %v3275_v45 }
 0x13b   : > { %v3278_v46 = vpop.trf.xlu0 }
 0x13c   : > { %2110 = vmatprep.mubr.f32.mxu0 %v3278_v46 }
 0x13f   : > { %v3281_v47 = vpop.trf.xlu0 }
 0x140   : > { %2111 = vmatmul.mubr.f32.gmra.mrb[14].mxu0 %v3281_v47 }
 0x141   : > { %2201 = vmatprep.mubr.f32.mxu0 %v3194_v11 }
 0x144   : > { %2202 = vmatmul.mubr.f32.vlgmr.msra.gmra.mrb[16].mxu0 %v3203_v15 }
 0x145   : > { %2204 = vmatprep.mubr.f32.mxu0 %v3212_v19 }
 0x148   : > { %2205 = vmatmul.mubr.f32.gmra.mrb[18].mxu0 %v3221_v23 }
 0x149   : > { %2207 = vmatprep.mubr.f32.mxu0 %v3230_v27 }
 0x14c   : > { %2208 = vmatmul.mubr.f32.gmra.mrb[20].mxu0 %v3239_v31 }
 0x14d   : > { %2210 = vmatprep.mubr.f32.mxu0 %v3248_v35 }
 0x150   : > { %2211 = vmatmul.mubr.f32.gmra.mrb[22].mxu0 %v3257_v39 }
 0x151   : > { %2213 = vmatprep.mubr.f32.mxu0 %v3260_v40 }
 0x154   : > { %2214 = vmatmul.mubr.f32.gmra.mrb[24].mxu0 %v3263_v41 }
 0x155   : > { %2216 = vmatprep.mubr.f32.mxu0 %v3266_v42 }
 0x158   : > { %2217 = vmatmul.mubr.f32.gmra.mrb[26].mxu0 %v3269_v43 }
 0x159   : > { %2219 = vmatprep.mubr.f32.mxu0 %v3272_v44 }
 0x15c   : > { %2220 = vmatmul.mubr.f32.gmra.mrb[28].mxu0 %v3275_v45 }
 0x15d   : > { %2222 = vmatprep.mubr.f32.mxu0 %v3278_v46 }
 0x160   : > { %2223 = vmatmul.mubr.f32.gmra.mrb[30].mxu0 %v3281_v47 }
 0x1db   : > { %v2091_v48 = vpop.f32.mrb[0].mxu0 }
 0x1dc   : > { %v567_v49 = vpop.f32.mrb[1].mxu0 }
 0x1dd   : > { %2145 = vmatprep.mubr.msk.f32.mxu1 %vm646_vm0, %v567_v49  ;;  %v2369_v51 = vpack.c.bf16 %v2091_v48, %v567_v49 }
 0x1df   : > { %2371 = vmatprep.subr.msk.bf16.mxu1 %vm3302_vm1, %v2369_v51 }
 0x1e0   : > { %2374 = vmatpush3.bf16.xpose.msk.msra.mxu1 %vm3302_vm1, %v2369_v51 }
 0x1e3   : > { %v2094_v52 = vpop.f32.mrb[2].mxu0 }
 0x1e4   : > { %v577_v53 = vpop.f32.mrb[3].mxu0 }
 0x1e5   : > { %v2375_v54 = vpack.c.bf16 %v2094_v52, %v577_v53 }
 0x1e7   : > { %2377 = vmatprep.subr.msk.bf16.mxu1 %vm3302_vm1, %v2375_v54 }
 0x1e8   : > { %2380 = vmatpush3.bf16.xpose.msk.msra.mxu1 %vm3302_vm1, %v2375_v54 }
 0x1eb   : > { %v2097_v55 = vpop.f32.mrb[4].mxu0 }
 0x1ec   : > { %v587_v56 = vpop.f32.mrb[5].mxu0 }
 0x1ed   : > { %v2381_v57 = vpack.c.bf16 %v2097_v55, %v587_v56 }
 0x1ef   : > { %2383 = vmatprep.subr.msk.bf16.mxu1 %vm3302_vm1, %v2381_v57 }
 0x1f0   : > { %2386 = vmatpush3.bf16.xpose.msk.msra.mxu1 %vm3302_vm1, %v2381_v57 }
 0x1f3   : > { %v3319_v58 = vpop.f32.mrb[6].mxu0 }
 0x1f4   : > { %v597_v59 = vpop.f32.mrb[7].mxu0 }
 0x1f5   : > { %v2387_v60 = vpack.c.bf16 %v3319_v58, %v597_v59 }
 0x1f7   : > { %2389 = vmatprep.subr.msk.bf16.mxu1 %vm3302_vm1, %v2387_v60 }
 0x1f8   : > { %2392 = vmatpush3.bf16.xpose.msk.msra.mxu1 %vm3302_vm1, %v2387_v60 }
 0x1fb   : > { %v3326_v61 = vpop.f32.mrb[8].mxu0 }
 0x1fc   : > { %v607_v62 = vpop.f32.mrb[9].mxu0 }
 0x1fd   : > { %v2393_v63 = vpack.c.bf16 %v3326_v61, %v607_v62 }
 0x1ff   : > { %2395 = vmatprep.subr.msk.bf16.mxu1 %vm3302_vm1, %v2393_v63 }
 0x200   : > { %2398 = vmatpush3.bf16.xpose.msk.msra.mxu1 %vm3302_vm1, %v2393_v63 }
 0x203   : > { %v3333_v0 = vpop.f32.mrb[10].mxu0 }
 0x204   : > { %v3335_v1 = vpop.f32.mrb[11].mxu0 }
 0x205   : > { %v2399_v2 = vpack.c.bf16 %v3333_v0, %v3335_v1 }
 0x207   : > { %2401 = vmatprep.subr.msk.bf16.mxu1 %vm3302_vm1, %v2399_v2 }
 0x208   : > { %2404 = vmatpush3.bf16.xpose.msk.msra.mxu1 %vm3302_vm1, %v2399_v2 }
 0x20b   : > { %v3343_v3 = vpop.f32.mrb[12].mxu0 }
 0x20c   : > { %v3345_v4 = vpop.f32.mrb[13].mxu0 }
 0x20d   : > { %v2405_v5 = vpack.c.bf16 %v3343_v3, %v3345_v4 }
 0x20f   : > { %2407 = vmatprep.subr.msk.bf16.mxu1 %vm3302_vm1, %v2405_v5 }
 0x210   : > { %2410 = vmatpush3.bf16.xpose.msk.msra.mxu1 %vm3302_vm1, %v2405_v5 }
 0x213   : > { %v3353_v6 = vpop.f32.mrb[14].mxu0 }
 0x214   : > { %v3355_v7 = vpop.f32.mrb[15].mxu0 }
 0x215   : > { %v2411_v8 = vpack.c.bf16 %v3353_v6, %v3355_v7 }
 0x217   : > { %2413 = vmatprep.subr.msk.bf16.mxu1 %vm3302_vm1, %v2411_v8  ;;  %v2203_v10 = vpop.f32.mrb[16].mxu0 }
 0x218   : > { %v1191_v12 = vadd.f32 %v2203_v10, %v3362_v9  ;;  %2416 = vmatpush3.bf16.xpose.msk.msra.mxu1 %vm3302_vm1, %v2411_v8  ;;  %v1185_v13 = vpop.f32.mrb[17].mxu0 }
 0x219   : > { %v1186_v14 = vadd.f32 %v3362_v9, %v1185_v13 }
 0x21b   : > { %v2449_v16 = vpack.c.bf16 %v1191_v12, %v1186_v14  ;;  %v2206_v17 = vpop.f32.mrb[18].mxu0 }
 0x21c   : > { %v1201_v18 = vadd.f32 %v2206_v17, %v3362_v9  ;;  %v1195_v20 = vpop.f32.mrb[19].mxu0 }
 0x21d   : > { %v1196_v21 = vadd.f32 %v3362_v9, %v1195_v20  ;;  %2450 = vmatprep.subr.bf16.mxu0 %v2449_v16 }
 0x21e   : > { %2452 = vmatpush3.bf16.msra.mxu0 %v2449_v16 }
 0x21f   : > { %v2453_v22 = vpack.c.bf16 %v1201_v18, %v1196_v21  ;;  %2146 = vmatmul.mubr.msk.f32.vlgmr.msra.gmra.mrb[0].mxu1 %vm646_vm0, %v2091_v48  ;;  %v2209_v24 = vpop.f32.mrb[20].mxu0 }
 0x220   : > { %v1211_v25 = vadd.f32 %v2209_v24, %v3362_v9  ;;  %2148 = vmatprep.mubr.msk.f32.mxu1 %vm646_vm0, %v577_v53  ;;  %v1205_v26 = vpop.f32.mrb[21].mxu0 }
 0x221   : > { %v1206_v28 = vadd.f32 %v3362_v9, %v1205_v26  ;;  %2454 = vmatprep.subr.bf16.mxu0 %v2453_v22 }
 0x222   : > { %2456 = vmatpush3.bf16.msra.mxu0 %v2453_v22 }
 0x223   : > { %v2457_v29 = vpack.c.bf16 %v1211_v25, %v1206_v28  ;;  %2149 = vmatmul.mubr.msk.f32.gmra.mrb[2].mxu1 %vm646_vm0, %v2094_v52  ;;  %v2212_v30 = vpop.f32.mrb[22].mxu0 }
 0x224   : > { %v1221_v32 = vadd.f32 %v2212_v30, %v3362_v9  ;;  %2151 = vmatprep.mubr.msk.f32.mxu1 %vm646_vm0, %v587_v56  ;;  %v1215_v33 = vpop.f32.mrb[23].mxu0 }
 0x225   : > { %v1216_v34 = vadd.f32 %v3362_v9, %v1215_v33  ;;  %2458 = vmatprep.subr.bf16.mxu0 %v2457_v29 }
 0x226   : > { %2460 = vmatpush3.bf16.msra.mxu0 %v2457_v29 }
 0x227   : > { %v2461_v36 = vpack.c.bf16 %v1221_v32, %v1216_v34  ;;  %2152 = vmatmul.mubr.msk.f32.gmra.mrb[4].mxu1 %vm646_vm0, %v2097_v55  ;;  %v2215_v37 = vpop.f32.mrb[24].mxu0 }
 0x228   : > { %v1231_v38 = vadd.f32 %v2215_v37, %v3362_v9  ;;  %2154 = vmatprep.mubr.msk.f32.mxu1 %vm646_vm0, %v597_v59  ;;  %v1225_v48 = vpop.f32.mrb[25].mxu0 }
 0x229   : > { %v1226_v49 = vadd.f32 %v3362_v9, %v1225_v48  ;;  %2462 = vmatprep.subr.bf16.mxu0 %v2461_v36 }
 0x22a   : > { %2464 = vmatpush3.bf16.msra.mxu0 %v2461_v36 }
 0x22b   : > { %v2465_v50 = vpack.c.bf16 %v1231_v38, %v1226_v49  ;;  %2155 = vmatmul.mubr.msk.f32.gmra.mrb[6].mxu1 %vm646_vm0, %v3319_v58  ;;  %v2218_v51 = vpop.f32.mrb[26].mxu0 }
 0x22c   : > { %v1241_v52 = vadd.f32 %v2218_v51, %v3362_v9  ;;  %2157 = vmatprep.mubr.msk.f32.mxu1 %vm646_vm0, %v607_v62  ;;  %v1235_v53 = vpop.f32.mrb[27].mxu0 }
 0x22d   : > { %v1236_v54 = vadd.f32 %v3362_v9, %v1235_v53  ;;  %2466 = vmatprep.subr.bf16.mxu0 %v2465_v50 }
 0x22e   : > { %2468 = vmatpush3.bf16.msra.mxu0 %v2465_v50 }
 0x22f   : > { %v2469_v55 = vpack.c.bf16 %v1241_v52, %v1236_v54  ;;  %2158 = vmatmul.mubr.msk.f32.gmra.mrb[8].mxu1 %vm646_vm0, %v3326_v61  ;;  %v2221_v56 = vpop.f32.mrb[28].mxu0 }
 0x230   : > { %v1251_v57 = vadd.f32 %v2221_v56, %v3362_v9  ;;  %2160 = vmatprep.mubr.msk.f32.mxu1 %vm646_vm0, %v3335_v1  ;;  %v1245_v58 = vpop.f32.mrb[29].mxu0 }
 0x231   : > { %v1246_v59 = vadd.f32 %v3362_v9, %v1245_v58  ;;  %2470 = vmatprep.subr.bf16.mxu0 %v2469_v55 }
 0x232   : > { %2472 = vmatpush3.bf16.msra.mxu0 %v2469_v55 }
 0x233   : > { %v2473_v60 = vpack.c.bf16 %v1251_v57, %v1246_v59  ;;  %2161 = vmatmul.mubr.msk.f32.gmra.mrb[10].mxu1 %vm646_vm0, %v3333_v0  ;;  %v2224_v62 = vpop.f32.mrb[30].mxu0 }
 0x234   : > { %v1261_v63 = vadd.f32 %v2224_v62, %v3362_v9  ;;  %2163 = vmatprep.mubr.msk.f32.mxu1 %vm646_vm0, %v3345_v4  ;;  %v1255_v61 = vpop.f32.mrb[31].mxu0 }
 0x235   : > { %v1256_v2 = vadd.f32 %v3362_v9, %v1255_v61  ;;  %2474 = vmatprep.subr.bf16.mxu0 %v2473_v60 }
 0x236   : > { %2476 = vmatpush3.bf16.msra.mxu0 %v2473_v60 }
 0x237   : > { %v2477_v1 = vpack.c.bf16 %v1261_v63, %v1256_v2  ;;  %2164 = vmatmul.mubr.msk.f32.gmra.mrb[12].mxu1 %vm646_vm0, %v3343_v3 }
 0x238   : > { %2166 = vmatprep.mubr.msk.f32.mxu1 %vm646_vm0, %v3355_v7 }
 0x239   : > { %2478 = vmatprep.subr.bf16.mxu0 %v2477_v1 }
 0x23a   : > { %2480 = vmatpush3.bf16.msra.mxu0 %v2477_v1 }
 0x23b   : > { %2167 = vmatmul.mubr.msk.f32.gmra.mrb[14].mxu1 %vm646_vm0, %v3353_v6 }
 0x2f2   : > { %v2147_v0 = vpop.f32.mrb[0].mxu1 }
 0x2f3   : > { %842 = vmax.xlane.f32.xlu1 %v2147_v0  ;;  %v761_v4 = vpop.f32.mrb[1].mxu1 }
 0x2f6   : > { %v2150_v5 = vpop.f32.mrb[2].mxu1 }
 0x2f7   : > { %840 = vmax.xlane.f32.xlu1 %v761_v4  ;;  %v771_v8 = vpop.f32.mrb[3].mxu1 }
 0x2fa   : > { %v2153_v9 = vpop.f32.mrb[4].mxu1 }
 0x2fb   : > { %846 = vmax.xlane.f32.xlu1 %v2150_v5  ;;  %v781_v10 = vpop.f32.mrb[5].mxu1 }
 0x2fe   : > { %v2156_v12 = vpop.f32.mrb[6].mxu1 }
 0x2ff   : > { %844 = vmax.xlane.f32.xlu1 %v771_v8  ;;  %v791_v3 = vpop.f32.mrb[7].mxu1 }
 0x302   : > { %v3407_v13 = vpop.f32.mrb[8].mxu1 }
 0x303   : > { %850 = vmax.xlane.f32.xlu1 %v2153_v9  ;;  %v3409_v7 = vpop.f32.mrb[9].mxu1 }
 0x306   : > { %v3411_v14 = vpop.f32.mrb[10].mxu1 }
 0x307   : > { %848 = vmax.xlane.f32.xlu1 %v781_v10  ;;  %v3413_v6 = vpop.f32.mrb[11].mxu1 }
 0x30a   : > { %v3415_v16 = vpop.f32.mrb[12].mxu1 }
 0x30b   : > { %854 = vmax.xlane.f32.xlu1 %v2156_v12  ;;  %v3417_v17 = vpop.f32.mrb[13].mxu1 }
 0x30e   : > { %v3419_v18 = vpop.f32.mrb[14].mxu1 }
 0x30f   : > { %852 = vmax.xlane.f32.xlu1 %v791_v3  ;;  %v3421_v20 = vpop.f32.mrb[15].mxu1 }
 0x313   : > { %858 = vmax.xlane.f32.xlu1 %v3407_v13 }
 0x317   : > { %856 = vmax.xlane.f32.xlu1 %v3409_v7 }
 0x31b   : > { %862 = vmax.xlane.f32.xlu1 %v3411_v14 }
 0x31f   : > { %860 = vmax.xlane.f32.xlu1 %v3413_v6 }
 0x323   : > { %866 = vmax.xlane.f32.xlu1 %v3415_v16 }
 0x327   : > { %864 = vmax.xlane.f32.xlu1 %v3417_v17 }
 0x32b   : > { %868 = vmax.xlane.f32.xlu1 %v3421_v20 }
 0x32f   : > { %870 = vmax.xlane.f32.xlu1 %v3419_v18 }
 0x380   : > { %v843_v21 = vpop.xlane.xlu1 %842 }
 0x381   : > { %v873_v22 = vsub.f32 %v2147_v0, %v843_v21 }
 0x383   : > { %v890_v24 = vmul.f32 1.442695, %v873_v22 }
 0x384   : > { %v841_v25 = vpop.xlane.xlu1 %840 }
 0x385   : > { %2579 = vpow2.f32 %v890_v24  ;;  %v872_v26 = vsub.f32 %v761_v4, %v841_v25 }
 0x387   : > { %v888_v28 = vmul.f32 1.442695, %v872_v26 }
 0x388   : > { %v847_v29 = vpop.xlane.xlu1 %846 }
 0x389   : > { %2581 = vpow2.f32 %v888_v28  ;;  %v875_v30 = vsub.f32 %v2150_v5, %v847_v29 }
 0x38b   : > { %v894_v32 = vmul.f32 1.442695, %v875_v30 }
 0x38c   : > { %v845_v33 = vpop.xlane.xlu1 %844 }
 0x38d   : > { %2583 = vpow2.f32 %v894_v32  ;;  %v874_v34 = vsub.f32 %v771_v8, %v845_v33 }
 0x38f   : > { %v3431_v36 = vpop.eup %2579  ;;  %v892_v37 = vmul.f32 1.442695, %v874_v34 }
 0x390   : > { %v851_v38 = vpop.xlane.xlu1 %850  ;;  %922 = vadd.xlane.f32.xlu1 %v3431_v36 }
 0x391   : > { %2585 = vpow2.f32 %v892_v37  ;;  %v877_v48 = vsub.f32 %v2153_v9, %v851_v38 }
 0x393   : > { %v3434_v49 = vpop.eup %2581  ;;  %v898_v50 = vmul.f32 1.442695, %v877_v48 }
 0x394   : > { %920 = vadd.xlane.f32.xlu0 %v3434_v49  ;;  %v849_v51 = vpop.xlane.xlu1 %848 }
 0x395   : > { %2587 = vpow2.f32 %v898_v50  ;;  %v876_v52 = vsub.f32 %v781_v10, %v849_v51 }
 0x397   : > { %v3437_v53 = vpop.eup %2583  ;;  %v896_v54 = vmul.f32 1.442695, %v876_v52 }
 0x398   : > { %v855_v55 = vpop.xlane.xlu1 %854  ;;  %926 = vadd.xlane.f32.xlu1 %v3437_v53 }
 0x399   : > { %2589 = vpow2.f32 %v896_v54  ;;  %v879_v56 = vsub.f32 %v2156_v12, %v855_v55 }
 0x39b   : > { %v3440_v57 = vpop.eup %2585  ;;  %v902_v58 = vmul.f32 1.442695, %v879_v56 }
 0x39c   : > { %v853_v59 = vpop.xlane.xlu1 %852  ;;  %924 = vadd.xlane.f32.xlu1 %v3440_v57 }
 0x39d   : > { %2591 = vpow2.f32 %v902_v58  ;;  %v878_v60 = vsub.f32 %v791_v3, %v853_v59 }
 0x39f   : > { %v3443_v62 = vpop.eup %2587  ;;  %v900_v63 = vmul.f32 1.442695, %v878_v60 }
 0x3a0   : > { %v859_v61 = vpop.xlane.xlu1 %858  ;;  %930 = vadd.xlane.f32.xlu1 %v3443_v62 }
 0x3a1   : > { %2593 = vpow2.f32 %v900_v63  ;;  %v881_v2 = vsub.f32 %v3407_v13, %v859_v61 }
 0x3a3   : > { %v3447_v1 = vpop.eup %2589  ;;  %v906_v0 = vmul.f32 1.442695, %v881_v2 }
 0x3a4   : > { %v857_v4 = vpop.xlane.xlu1 %856  ;;  %928 = vadd.xlane.f32.xlu1 %v3447_v1 }
 0x3a5   : > { %2595 = vpow2.f32 %v906_v0  ;;  %v880_v5 = vsub.f32 %v3409_v7, %v857_v4 }
 0x3a7   : > { %v3451_v8 = vpop.eup %2591  ;;  %v904_v9 = vmul.f32 1.442695, %v880_v5 }
 0x3a8   : > { %v863_v10 = vpop.xlane.xlu1 %862  ;;  %934 = vadd.xlane.f32.xlu1 %v3451_v8 }
 0x3a9   : > { %2597 = vpow2.f32 %v904_v9  ;;  %v883_v12 = vsub.f32 %v3411_v14, %v863_v10 }
 0x3ab   : > { %v3455_v3 = vpop.eup %2593  ;;  %v910_v13 = vmul.f32 1.442695, %v883_v12 }
 0x3ac   : > { %v861_v21 = vpop.xlane.xlu1 %860  ;;  %932 = vadd.xlane.f32.xlu1 %v3455_v3 }
 0x3ad   : > { %2599 = vpow2.f32 %v910_v13  ;;  %v882_v22 = vsub.f32 %v3413_v6, %v861_v21 }
 0x3af   : > { %v3459_v24 = vpop.eup %2595  ;;  %v908_v7 = vmul.f32 1.442695, %v882_v22 }
 0x3b0   : > { %v867_v25 = vpop.xlane.xlu1 %866  ;;  %938 = vadd.xlane.f32.xlu1 %v3459_v24 }
 0x3b1   : > { %2601 = vpow2.f32 %v908_v7  ;;  %v885_v26 = vsub.f32 %v3415_v16, %v867_v25 }
 0x3b3   : > { %v3463_v28 = vpop.eup %2597  ;;  %v914_v14 = vmul.f32 1.442695, %v885_v26 }
 0x3b4   : > { %v865_v29 = vpop.xlane.xlu1 %864  ;;  %936 = vadd.xlane.f32.xlu1 %v3463_v28 }
 0x3b5   : > { %2603 = vpow2.f32 %v914_v14  ;;  %v884_v30 = vsub.f32 %v3417_v17, %v865_v29 }
 0x3b7   : > { %v3467_v32 = vpop.eup %2599  ;;  %v912_v6 = vmul.f32 1.442695, %v884_v30 }
 0x3b8   : > { %942 = vadd.xlane.f32.xlu1 %v3467_v32  ;;  %v869_v33 = vpop.xlane.xlu1 %868 }
 0x3b9   : > { %2605 = vpow2.f32 %v912_v6  ;;  %v886_v34 = vsub.f32 %v3421_v20, %v869_v33 }
 0x3bb   : > { %v3471_v37 = vpop.eup %2601  ;;  %v916_v16 = vmul.f32 1.442695, %v886_v34 }
 0x3bc   : > { %940 = vadd.xlane.f32.xlu1 %v3471_v37  ;;  %v871_v38 = vpop.xlane.xlu1 %870 }
 0x3bd   : > { %2607 = vpow2.f32 %v916_v16  ;;  %v887_v48 = vsub.f32 %v3419_v18, %v871_v38 }
 0x3bf   : > { %v3475_v50 = vpop.eup %2603  ;;  %v918_v17 = vmul.f32 1.442695, %v887_v48 }
 0x3c0   : > { %946 = vadd.xlane.f32.xlu0 %v3475_v50 }
 0x3c1   : > { %2609 = vpow2.f32 %v918_v17 }
 0x3c3   : > { %v3478_v51 = vpop.eup %2605 }
 0x3c4   : > { %944 = vadd.xlane.f32.xlu1 %v3478_v51 }
 0x3c7   : > { %v3481_v20 = vpop.eup %2607 }
 0x3c8   : > { %948 = vadd.xlane.f32.xlu1 %v3481_v20 }
 0x3cb   : > { %v3484_v52 = vpop.eup %2609 }
 0x3cc   : > { %950 = vadd.xlane.f32.xlu0 %v3484_v52 }
 0x41d   : > { %v923_v54 = vpop.xlane.xlu1 %922 }
 0x421   : > { %v921_v18 = vpop.xlane.xlu0 %920 }
 0x422   : > { %2611 = vrcp.f32 %v921_v18 }
 0x423   : > { %2613 = vrcp.f32 %v923_v54 }
 0x425   : > { %v927_v55 = vpop.xlane.xlu1 %926 }
 0x429   : > { %v925_v56 = vpop.xlane.xlu1 %924 }
 0x42a   : > { %2615 = vrcp.f32 %v925_v56 }
 0x42b   : > { %2617 = vrcp.f32 %v927_v55 }
 0x42c   : > { %v2612_v58 = vpop.eup %2611 }
 0x42d   : > { %v931_v59 = vpop.xlane.xlu1 %930  ;;  %v953_v60 = vmul.f32 %v2612_v58, %v3434_v49  ;;  %v2614_v63 = vpop.eup %2613 }
 0x42e   : > { %v955_v2 = vmul.f32 %v2614_v63, %v3431_v36 }
 0x42f   : > { %984 = vxpose.xlu1.b32.start [1/16] %v953_v60, 128 }
 0x431   : > { %v929_v61 = vpop.xlane.xlu1 %928 }
 0x432   : > { %2619 = vrcp.f32 %v929_v61 }
 0x433   : > { %985 = vxpose.xlu1.b32.cont [2/16] %v955_v2, 128  ;;  %2621 = vrcp.f32 %v931_v59 }
 0x434   : > { %v2616_v0 = vpop.eup %2615 }
 0x435   : > { %v935_v4 = vpop.xlane.xlu1 %934  ;;  %v957_v5 = vmul.f32 %v2616_v0, %v3440_v57  ;;  %v2618_v9 = vpop.eup %2617 }
 0x436   : > { %v959_v12 = vmul.f32 %v2618_v9, %v3437_v53 }
 0x437   : > { %986 = vxpose.xlu1.b32.cont [3/16] %v957_v5, 128 }
 0x439   : > { %v933_v10 = vpop.xlane.xlu1 %932 }
 0x43a   : > { %2623 = vrcp.f32 %v933_v10 }
 0x43b   : > { %987 = vxpose.xlu1.b32.cont [4/16] %v959_v12, 128  ;;  %2625 = vrcp.f32 %v935_v4 }
 0x43c   : > { %v2620_v49 = vpop.eup %2619 }
 0x43d   : > { %v939_v13 = vpop.xlane.xlu1 %938  ;;  %v961_v21 = vmul.f32 %v2620_v49, %v3447_v1  ;;  %v2622_v36 = vpop.eup %2621  ;;  %v1425_v49 = vld [vmem:[#allocation7] sm:$0xff] }
 0x43e   : > { %v963_v7 = vmul.f32 %v2622_v36, %v3443_v62 }
 0x43f   : > { %988 = vxpose.xlu1.b32.cont [5/16] %v961_v21, 128  ;;  %v1427_v21 = vld [vmem:[#allocation7 + $0x10] sm:$0xff] }
 0x441   : > { %v937_v22 = vpop.xlane.xlu1 %936 }
 0x442   : > { %2627 = vrcp.f32 %v937_v22  ;;  %v1428_v22 = vld [vmem:[#allocation7 + $0x18] sm:$0xff] }
 0x443   : > { %989 = vxpose.xlu1.b32.cont [6/16] %v963_v7, 128  ;;  %2629 = vrcp.f32 %v939_v13  ;;  %v1426_v13 = vld [vmem:[#allocation7 + $0x8] sm:$0xff]  ;;  %v2485_v7 = vpack.c.bf16 %v1428_v22, %v1427_v21 }
 0x444   : > { %v2624_v57 = vpop.eup %2623  ;;  %v2481_v36 = vpack.c.bf16 %v1426_v13, %v1425_v49 }
 0x445   : > { %v943_v25 = vpop.xlane.xlu1 %942  ;;  %v965_v26 = vmul.f32 %v2624_v57, %v3455_v3  ;;  %v2626_v53 = vpop.eup %2625  ;;  %v1429_v57 = vld [vmem:[#allocation7 + $0x20] sm:$0xff] }
 0x446   : > { %v967_v29 = vmul.f32 %v2626_v53, %v3451_v8  ;;  %2482 = vmatprep.subr.bf16.mxu1 %v2481_v36  ;;  %v1431_v53 = vld [vmem:[#allocation7 + $0x30] sm:$0xff] }
 0x447   : > { %990 = vxpose.xlu1.b32.cont [7/16] %v965_v26, 128  ;;  %2484 = vmatpush3.bf16.msra.mxu1 %v2481_v36 }
 0x448   : > { %2486 = vmatprep.subr.bf16.mxu1 %v2485_v7 }
 0x449   : > { %v941_v14 = vpop.xlane.xlu1 %940 }
 0x44a   : > { %2631 = vrcp.f32 %v941_v14  ;;  %v1432_v14 = vld [vmem:[#allocation7 + $0x38] sm:$0xff] }
 0x44b   : > { %991 = vxpose.xlu1.b32.cont [8/16] %v967_v29, 128  ;;  %2633 = vrcp.f32 %v943_v25  ;;  %v1430_v25 = vld [vmem:[#allocation7 + $0x28] sm:$0xff]  ;;  %2488 = vmatpush3.bf16.msra.mxu1 %v2485_v7  ;;  %v2493_v29 = vpack.c.bf16 %v1432_v14, %v1431_v53 }
 0x44c   : > { %v2628_v1 = vpop.eup %2627  ;;  %v2489_v26 = vpack.c.bf16 %v1430_v25, %v1429_v57 }
 0x44d   : > { %v969_v30 = vmul.f32 %v2628_v1, %v3463_v28  ;;  %v2630_v6 = vpop.eup %2629  ;;  %v947_v62 = vpop.xlane.xlu0 %946  ;;  %v1433_v1 = vld [vmem:[#allocation7 + $0x40] sm:$0xff] }
 0x44e   : > { %v971_v34 = vmul.f32 %v2630_v6, %v3459_v24  ;;  %2490 = vmatprep.subr.bf16.mxu1 %v2489_v26 }
 0x44f   : > { %992 = vxpose.xlu1.b32.cont [9/16] %v969_v30, 128  ;;  %v1434_v30 = vld [vmem:[#allocation7 + $0x48] sm:$0xff]  ;;  %2492 = vmatpush3.bf16.msra.mxu1 %v2489_v26 }
 0x450   : > { %2494 = vmatprep.subr.bf16.mxu1 %v2493_v29  ;;  %v2497_v6 = vpack.c.bf16 %v1434_v30, %v1433_v1 }
 0x451   : > { %v945_v33 = vpop.xlane.xlu1 %944 }
 0x452   : > { %2635 = vrcp.f32 %v945_v33  ;;  %v1436_v33 = vld [vmem:[#allocation7 + $0x58] sm:$0xff] }
 0x453   : > { %993 = vxpose.xlu1.b32.cont [10/16] %v971_v34, 128  ;;  %2637 = vrcp.f32 %v947_v62  ;;  %v1435_v62 = vld [vmem:[#allocation7 + $0x50] sm:$0xff]  ;;  %2496 = vmatpush3.bf16.msra.mxu1 %v2493_v29 }
 0x454   : > { %v2632_v3 = vpop.eup %2631  ;;  %2498 = vmatprep.subr.bf16.mxu1 %v2497_v6  ;;  %v2501_v34 = vpack.c.bf16 %v1436_v33, %v1435_v62 }
 0x455   : > { %v949_v16 = vpop.xlane.xlu1 %948  ;;  %v973_v38 = vmul.f32 %v2632_v3, %v3471_v37  ;;  %v2634_v8 = vpop.eup %2633  ;;  %v1437_v3 = vld [vmem:[#allocation7 + $0x60] sm:$0xff] }
 0x456   : > { %2639 = vrcp.f32 %v949_v16  ;;  %v975_v17 = vmul.f32 %v2634_v8, %v3467_v32  ;;  %v1438_v16 = vld [vmem:[#allocation7 + $0x68] sm:$0xff] }
 0x457   : > { %994 = vxpose.xlu1.b32.cont [11/16] %v973_v38, 128  ;;  %2500 = vmatpush3.bf16.msra.mxu1 %v2497_v6  ;;  %v2505_v38 = vpack.c.bf16 %v1438_v16, %v1437_v3 }
 0x458   : > { %2502 = vmatprep.subr.bf16.mxu1 %v2501_v34 }
 0x459   : > { %v951_v48 = vpop.xlane.xlu0 %950 }
 0x45a   : > { %2641 = vrcp.f32 %v951_v48 }
 0x45b   : > { %995 = vxpose.xlu1.b32.cont [12/16] %v975_v17, 128  ;;  %2504 = vmatpush3.bf16.msra.mxu1 %v2501_v34 }
 0x45c   : > { %v2636_v28 = vpop.eup %2635  ;;  %2506 = vmatprep.subr.bf16.mxu1 %v2505_v38 }
 0x45d   : > { %v977_v54 = vmul.f32 %v2636_v28, %v3478_v51  ;;  %v2638_v18 = vpop.eup %2637 }
 0x45e   : > { %v979_v24 = vmul.f32 %v2638_v18, %v3475_v50 }
 0x45f   : > { %996 = vxpose.xlu1.b32.cont [13/16] %v977_v54, 128  ;;  %2508 = vmatpush3.bf16.msra.mxu1 %v2505_v38 }
 0x460   : > { %v2640_v55 = vpop.eup %2639 }
 0x461   : > { %v981_v56 = vmul.f32 %v2640_v55, %v3481_v20 }
 0x463   : > { %997 = vxpose.xlu1.b32.cont [14/16] %v979_v24, 128 }
 0x464   : > { %v2642_v37 = vpop.eup %2641 }
 0x465   : > { %v983_v58 = vmul.f32 %v2642_v37, %v3484_v52 }
 0x467   : > { %998 = vxpose.xlu1.b32.cont [15/16] %v981_v56, 128 }
 0x46b   : > { %999 = vxpose.xlu1.b32.end [16/16] %v983_v58, 128 }
 0x4af   : > { %v3503_v59 = vpop.trf.xlu1 }
 0x4b0   : > { %1016 = vadd.xlane.f32.xlu0 %v3503_v59 }
 0x4b3   : > { %v3506_v32 = vpop.trf.xlu1 }
 0x4b4   : > { %1018 = vadd.xlane.f32.xlu0 %v3506_v32 }
 0x4b7   : > { %v3509_v51 = vpop.trf.xlu1 }
 0x4b8   : > { %1020 = vadd.xlane.f32.xlu0 %v3509_v51 }
 0x4bb   : > { %v3512_v50 = vpop.trf.xlu1 }
 0x4bc   : > { %1022 = vadd.xlane.f32.xlu0 %v3512_v50 }
 0x4bf   : > { %v3515_v20 = vpop.trf.xlu1 }
 0x4c0   : > { %1024 = vadd.xlane.f32.xlu0 %v3515_v20 }
 0x4c3   : > { %v3518_v52 = vpop.trf.xlu1 }
 0x4c4   : > { %1026 = vadd.xlane.f32.xlu0 %v3518_v52 }
 0x4c7   : > { %v3521_v60 = vpop.trf.xlu1 }
 0x4c8   : > { %1028 = vadd.xlane.f32.xlu0 %v3521_v60 }
 0x4cb   : > { %v3524_v63 = vpop.trf.xlu1 }
 0x4cc   : > { %1030 = vadd.xlane.f32.xlu0 %v3524_v63 }
 0x4cf   : > { %v3527_v61 = vpop.trf.xlu1 }
 0x4d0   : > { %1032 = vadd.xlane.f32.xlu0 %v3527_v61 }
 0x4d3   : > { %v3530_v2 = vpop.trf.xlu1 }
 0x4d4   : > { %1034 = vadd.xlane.f32.xlu0 %v3530_v2 }
 0x4d7   : > { %v3533_v0 = vpop.trf.xlu1 }
 0x4d8   : > { %1036 = vadd.xlane.f32.xlu0 %v3533_v0 }
 0x4db   : > { %v3536_v4 = vpop.trf.xlu1 }
 0x4dc   : > { %1038 = vadd.xlane.f32.xlu0 %v3536_v4 }
 0x4df   : > { %v3539_v5 = vpop.trf.xlu1 }
 0x4e0   : > { %1040 = vadd.xlane.f32.xlu0 %v3539_v5 }
 0x4e3   : > { %v3542_v9 = vpop.trf.xlu1 }
 0x4e4   : > { %1042 = vadd.xlane.f32.xlu0 %v3542_v9 }
 0x4e7   : > { %v3545_v10 = vpop.trf.xlu1 }
 0x4e8   : > { %1044 = vadd.xlane.f32.xlu0 %v3545_v10 }
 0x4eb   : > { %v3548_v12 = vpop.trf.xlu1 }
 0x4ec   : > { %1046 = vadd.xlane.f32.xlu0 %v3548_v12 }
 0x53d   : > { %v1017_v8 = vpop.xlane.xlu0 %1016 }
 0x53e   : > { %v1048_v48 = vadd.f32 1e-09, %v1017_v8 }
 0x540   : > { %2643 = vrcp.f32 %v1048_v48 }
 0x541   : > { %v1019_v17 = vpop.xlane.xlu0 %1018 }
 0x542   : > { %v1049_v28 = vadd.f32 1e-09, %v1019_v17 }
 0x544   : > { %2645 = vrcp.f32 %v1049_v28 }
 0x545   : > { %v1021_v54 = vpop.xlane.xlu0 %1020 }
 0x546   : > { %v1050_v18 = vadd.f32 1e-09, %v1021_v54 }
 0x548   : > { %2647 = vrcp.f32 %v1050_v18 }
 0x549   : > { %v1023_v24 = vpop.xlane.xlu0 %1022 }
 0x54a   : > { %v2644_v55 = vpop.eup %2643  ;;  %v1051_v56 = vadd.f32 1e-09, %v1023_v24 }
 0x54b   : > { %v1065_v37 = vmul.f32 %v2644_v55, %v3503_v59 }
 0x54c   : > { %2649 = vrcp.f32 %v1051_v56 }
 0x54d   : > { %2257 = vmatprep.mubr.f32.mxu0 %v1065_v37  ;;  %v1025_v58 = vpop.xlane.xlu0 %1024 }
 0x54e   : > { %v2646_v49 = vpop.eup %2645  ;;  %v1052_v13 = vadd.f32 1e-09, %v1025_v58 }
 0x54f   : > { %v1067_v21 = vmul.f32 %v2646_v49, %v3506_v32 }
 0x550   : > { %2651 = vrcp.f32 %v1052_v13 }
 0x551   : > { %2258 = vmatmul.mubr.f32.vlgmr.msra.gmra.mrb[32].mxu0 %v1067_v21  ;;  %v1027_v36 = vpop.xlane.xlu0 %1026 }
 0x552   : > { %v2648_v22 = vpop.eup %2647  ;;  %v1053_v7 = vadd.f32 1e-09, %v1027_v36 }
 0x553   : > { %v1069_v57 = vmul.f32 %v2648_v22, %v3509_v51 }
 0x554   : > { %2653 = vrcp.f32 %v1053_v7 }
 0x555   : > { %2260 = vmatprep.mubr.f32.mxu0 %v1069_v57  ;;  %v1029_v25 = vpop.xlane.xlu0 %1028 }
 0x556   : > { %v2650_v26 = vpop.eup %2649  ;;  %v1054_v53 = vadd.f32 1e-09, %v1029_v25 }
 0x557   : > { %v1071_v59 = vmul.f32 %v2650_v26, %v3512_v50 }
 0x558   : > { %2655 = vrcp.f32 %v1054_v53  ;;  %v1439_v53 = vld [vmem:[#allocation7 + $0x70] sm:$0xff] }
 0x559   : > { %2261 = vmatmul.mubr.f32.gmra.mrb[34].mxu0 %v1071_v59  ;;  %v1031_v14 = vpop.xlane.xlu0 %1030  ;;  %v1440_v59 = vld [vmem:[#allocation7 + $0x78] sm:$0xff] }
 0x55a   : > { %v2652_v29 = vpop.eup %2651  ;;  %v1055_v1 = vadd.f32 1e-09, %v1031_v14  ;;  %v2509_v14 = vpack.c.bf16 %v1440_v59, %v1439_v53 }
 0x55b   : > { %v1073_v32 = vmul.f32 %v2652_v29, %v3515_v20 }
 0x55c   : > { %2657 = vrcp.f32 %v1055_v1  ;;  %2510 = vmatprep.subr.bf16.mxu1 %v2509_v14 }
 0x55d   : > { %2263 = vmatprep.mubr.f32.mxu0 %v1073_v32  ;;  %v1033_v30 = vpop.xlane.xlu0 %1032  ;;  %2512 = vmatpush3.bf16.msra.mxu1 %v2509_v14 }
 0x55e   : > { %v2654_v6 = vpop.eup %2653  ;;  %v1056_v62 = vadd.f32 1e-09, %v1033_v30 }
 0x55f   : > { %v1075_v51 = vmul.f32 %v2654_v6, %v3518_v52 }
 0x560   : > { %2659 = vrcp.f32 %v1056_v62 }
 0x561   : > { %2264 = vmatmul.mubr.f32.gmra.mrb[36].mxu0 %v1075_v51  ;;  %v1035_v33 = vpop.xlane.xlu0 %1034 }
 0x562   : > { %v2656_v34 = vpop.eup %2655  ;;  %v1057_v3 = vadd.f32 1e-09, %v1035_v33 }
 0x563   : > { %v1077_v50 = vmul.f32 %v2656_v34, %v3521_v60 }
 0x564   : > { %2661 = vrcp.f32 %v1057_v3 }
 0x565   : > { %2266 = vmatprep.mubr.f32.mxu0 %v1077_v50  ;;  %v1037_v16 = vpop.xlane.xlu0 %1036 }
 0x566   : > { %v2658_v38 = vpop.eup %2657  ;;  %v1058_v8 = vadd.f32 1e-09, %v1037_v16 }
 0x567   : > { %v1079_v20 = vmul.f32 %v2658_v38, %v3524_v63 }
 0x568   : > { %2663 = vrcp.f32 %v1058_v8 }
 0x569   : > { %2267 = vmatmul.mubr.f32.gmra.mrb[38].mxu0 %v1079_v20  ;;  %v1039_v48 = vpop.xlane.xlu0 %1038 }
 0x56a   : > { %v2660_v17 = vpop.eup %2659  ;;  %v1059_v28 = vadd.f32 1e-09, %v1039_v48 }
 0x56b   : > { %v1081_v52 = vmul.f32 %v2660_v17, %v3527_v61 }
 0x56c   : > { %2665 = vrcp.f32 %v1059_v28 }
 0x56d   : > { %2269 = vmatprep.mubr.f32.mxu0 %v1081_v52  ;;  %v1041_v54 = vpop.xlane.xlu0 %1040 }
 0x56e   : > { %v2662_v18 = vpop.eup %2661  ;;  %v1060_v24 = vadd.f32 1e-09, %v1041_v54 }
 0x56f   : > { %v1083_v60 = vmul.f32 %v2662_v18, %v3530_v2 }
 0x570   : > { %2667 = vrcp.f32 %v1060_v24 }
 0x571   : > { %2270 = vmatmul.mubr.f32.gmra.mrb[40].mxu0 %v1083_v60  ;;  %v1043_v55 = vpop.xlane.xlu0 %1042 }
 0x572   : > { %v2664_v56 = vpop.eup %2663  ;;  %v1061_v37 = vadd.f32 1e-09, %v1043_v55 }
 0x573   : > { %v1085_v63 = vmul.f32 %v2664_v56, %v3533_v0 }
 0x574   : > { %2669 = vrcp.f32 %v1061_v37 }
 0x575   : > { %2272 = vmatprep.mubr.f32.mxu0 %v1085_v63  ;;  %v1045_v58 = vpop.xlane.xlu0 %1044 }
 0x576   : > { %v2666_v49 = vpop.eup %2665  ;;  %v1062_v13 = vadd.f32 1e-09, %v1045_v58 }
 0x577   : > { %v1087_v61 = vmul.f32 %v2666_v49, %v3536_v4  ;;  %v3586_v49 = vld [vmem:[%s3738_s6] ss:$0 sm:$0xff] }
 0x578   : > { %2671 = vrcp.f32 %v1062_v13 }
 0x579   : > { %2273 = vmatmul.mubr.f32.gmra.mrb[42].mxu0 %v1087_v61  ;;  %v1047_v21 = vpop.xlane.xlu0 %1046  ;;  %v3591_v61 = vld [vmem:[%s3739_s7] ss:$0 sm:$0xff] }
 0x57a   : > { %v2668_v36 = vpop.eup %2667  ;;  %v1063_v22 = vadd.f32 1e-09, %v1047_v21 }
 0x57b   : > { %v1089_v2 = vmul.f32 %v2668_v36, %v3539_v5 }
 0x57c   : > { %2673 = vrcp.f32 %v1063_v22 }
 0x57d   : > { %2275 = vmatprep.mubr.f32.mxu0 %v1089_v2 }
 0x57e   : > { %v2670_v7 = vpop.eup %2669 }
 0x57f   : > { %v1091_v57 = vmul.f32 %v2670_v7, %v3542_v9  ;;  %v3599_v7 = vld [vmem:[%s3740_s8] ss:$0 sm:$0xff] }
 0x581   : > { %2276 = vmatmul.mubr.f32.gmra.mrb[44].mxu0 %v1091_v57 }
 0x582   : > { %v2672_v0 = vpop.eup %2671 }
 0x583   : > { %v1093_v25 = vmul.f32 %v2672_v0, %v3545_v10 }
 0x585   : > { %2278 = vmatprep.mubr.f32.mxu0 %v1093_v25 }
 0x586   : > { %v2674_v26 = vpop.eup %2673 }
 0x587   : > { %v1095_v4 = vmul.f32 %v2674_v26, %v3548_v12 }
 0x589   : > { %2279 = vmatmul.mubr.f32.gmra.mrb[46].mxu0 %v1095_v4 }
 0x624   : > { %v2259_v5 = vpop.f32.mrb[32].mxu0 }
 0x625   : > { %v1330_v29 = vpop.f32.mrb[33].mxu0  ;;  %v1410_v9 = vsub.f32 %v3203_v15, %v2259_v5 }
 0x626   : > { %v1409_v1 = vsub.f32 %v3194_v11, %v1330_v29 }
 0x628   : > { %2313 = vmatprep.mubr.f32.mxu1 %v1409_v1 }
 0x629   : > { %2314 = vmatmul.mubr.f32.vlgmr.msra.gmra.mrb[16].mxu1 %v1410_v9 }
 0x62c   : > { %v2262_v32 = vpop.f32.mrb[34].mxu0 }
 0x62d   : > { %v1340_v10 = vpop.f32.mrb[35].mxu0  ;;  %v1412_v12 = vsub.f32 %v3221_v23, %v2262_v32 }
 0x62e   : > { %v1411_v30 = vsub.f32 %v3212_v19, %v1340_v10 }
 0x630   : > { %2316 = vmatprep.mubr.f32.mxu1 %v1411_v30 }
 0x631   : > { %2317 = vmatmul.mubr.f32.gmra.mrb[18].mxu1 %v1412_v12 }
 0x634   : > { %v2265_v6 = vpop.f32.mrb[36].mxu0 }
 0x635   : > { %v1350_v62 = vpop.f32.mrb[37].mxu0  ;;  %v1414_v33 = vsub.f32 %v3239_v31, %v2265_v6 }
 0x636   : > { %v1413_v51 = vsub.f32 %v3230_v27, %v1350_v62 }
 0x638   : > { %2319 = vmatprep.mubr.f32.mxu1 %v1413_v51 }
 0x639   : > { %2320 = vmatmul.mubr.f32.gmra.mrb[20].mxu1 %v1414_v33 }
 0x63c   : > { %v2268_v34 = vpop.f32.mrb[38].mxu0 }
 0x63d   : > { %v1360_v3 = vpop.f32.mrb[39].mxu0  ;;  %v1416_v16 = vsub.f32 %v3257_v39, %v2268_v34 }
 0x63e   : > { %v1415_v50 = vsub.f32 %v3248_v35, %v1360_v3 }
 0x640   : > { %2322 = vmatprep.mubr.f32.mxu1 %v1415_v50 }
 0x641   : > { %2323 = vmatmul.mubr.f32.gmra.mrb[22].mxu1 %v1416_v16 }
 0x644   : > { %v2271_v38 = vpop.f32.mrb[40].mxu0 }
 0x645   : > { %v1370_v8 = vpop.f32.mrb[41].mxu0  ;;  %v1418_v48 = vsub.f32 %v3263_v41, %v2271_v38 }
 0x646   : > { %v1417_v20 = vsub.f32 %v3260_v40, %v1370_v8 }
 0x648   : > { %2325 = vmatprep.mubr.f32.mxu1 %v1417_v20 }
 0x649   : > { %2326 = vmatmul.mubr.f32.gmra.mrb[24].mxu1 %v1418_v48 }
 0x64c   : > { %v2274_v17 = vpop.f32.mrb[42].mxu0 }
 0x64d   : > { %v1380_v28 = vpop.f32.mrb[43].mxu0  ;;  %v1420_v54 = vsub.f32 %v3269_v43, %v2274_v17 }
 0x64e   : > { %v1419_v52 = vsub.f32 %v3266_v42, %v1380_v28 }
 0x650   : > { %2328 = vmatprep.mubr.f32.mxu1 %v1419_v52 }
 0x651   : > { %2329 = vmatmul.mubr.f32.gmra.mrb[26].mxu1 %v1420_v54 }
 0x654   : > { %v2277_v18 = vpop.f32.mrb[44].mxu0 }
 0x655   : > { %v1390_v24 = vpop.f32.mrb[45].mxu0  ;;  %v1422_v55 = vsub.f32 %v3275_v45, %v2277_v18 }
 0x656   : > { %v1421_v60 = vsub.f32 %v3272_v44, %v1390_v24 }
 0x658   : > { %2331 = vmatprep.mubr.f32.mxu1 %v1421_v60 }
 0x659   : > { %2332 = vmatmul.mubr.f32.gmra.mrb[28].mxu1 %v1422_v55 }
 0x65c   : > { %v2280_v56 = vpop.f32.mrb[46].mxu0 }
 0x65d   : > { %v1400_v37 = vpop.f32.mrb[47].mxu0  ;;  %v1424_v58 = vsub.f32 %v3281_v47, %v2280_v56 }
 0x65e   : > { %v1423_v63 = vsub.f32 %v3278_v46, %v1400_v37 }
 0x660   : > { %2334 = vmatprep.mubr.f32.mxu1 %v1423_v63 }
 0x661   : > { %2335 = vmatmul.mubr.f32.gmra.mrb[30].mxu1 %v1424_v58 }
 0x6fc   : > { %v2315_v13 = vpop.f32.mrb[16].mxu1 }
 0x6fd   : > { %v1520_v21 = vadd.f32 %v2315_v13, %v3586_v49  ;;  %v1514_v36 = vpop.f32.mrb[17].mxu1 }
 0x6fe   : > { %v1515_v22 = vadd.f32 %v3586_v49, %v1514_v36 }
 0x6ff   : > { %v1601_v2 = vmul.f32 %v3591_v61, %v1520_v21 }
 0x700   : > { %v1600_v57 = vmul.f32 %v3591_v61, %v1515_v22 }
 0x701   : > { %v1624_v0 = vadd.f32 %v3599_v7, %v1601_v2 }
 0x702   : > { %v1623_v25 = vadd.f32 %v3599_v7, %v1600_v57 }
 0x703   : > { %v1640_v14 = vmax.f32 %v1624_v0, 0.0 }
 0x704   : > { %v1639_v26 = vmax.f32 %v1623_v25, 0.0  ;;  %v2318_v4 = vpop.f32.mrb[18].mxu1 }
 0x705   : > { %v1530_v53 = vadd.f32 %v2318_v4, %v3586_v49  ;;  %v1524_v59 = vpop.f32.mrb[19].mxu1  ;;  %v1656_v32 = vadd.f32 %v1640_v14, %v3203_v15 }
 0x706   : > { %v1655_v5 = vadd.f32 %v1639_v26, %v3194_v11  ;;  %v1525_v29 = vadd.f32 %v3586_v49, %v1524_v59 }
 0x707   : > { %v1603_v1 = vmul.f32 %v3591_v61, %v1530_v53 }
 0x708   : > { %v1602_v9 = vmul.f32 %v3591_v61, %v1525_v29  ;;  %1671 = vxpose.xlu0.b32.start [1/16] %v1655_v5, 128 }
 0x709   : > { %v1626_v10 = vadd.f32 %v3599_v7, %v1603_v1 }
 0x70a   : > { %v1625_v30 = vadd.f32 %v3599_v7, %v1602_v9 }
 0x70b   : > { %v1642_v11 = vmax.f32 %v1626_v10, 0.0 }
 0x70c   : > { %v1641_v12 = vmax.f32 %v1625_v30, 0.0  ;;  %v2321_v6 = vpop.f32.mrb[20].mxu1  ;;  %1672 = vxpose.xlu0.b32.cont [2/16] %v1656_v32, 128 }
 0x70d   : > { %v1540_v62 = vadd.f32 %v2321_v6, %v3586_v49  ;;  %v1534_v51 = vpop.f32.mrb[21].mxu1  ;;  %v1658_v15 = vadd.f32 %v1642_v11, %v3221_v23 }
 0x70e   : > { %v1657_v33 = vadd.f32 %v1641_v12, %v3212_v19  ;;  %v1535_v34 = vadd.f32 %v3586_v49, %v1534_v51 }
 0x70f   : > { %v1605_v3 = vmul.f32 %v3591_v61, %v1540_v62 }
 0x710   : > { %v1604_v50 = vmul.f32 %v3591_v61, %v1535_v34  ;;  %1673 = vxpose.xlu0.b32.cont [3/16] %v1657_v33, 128 }
 0x711   : > { %v1628_v16 = vadd.f32 %v3599_v7, %v1605_v3 }
 0x712   : > { %v1627_v38 = vadd.f32 %v3599_v7, %v1604_v50 }
 0x713   : > { %v1644_v19 = vmax.f32 %v1628_v16, 0.0 }
 0x714   : > { %v1643_v8 = vmax.f32 %v1627_v38, 0.0  ;;  %v2324_v20 = vpop.f32.mrb[22].mxu1  ;;  %1674 = vxpose.xlu0.b32.cont [4/16] %v1658_v15, 128 }
 0x715   : > { %v1550_v48 = vadd.f32 %v2324_v20, %v3586_v49  ;;  %v1544_v17 = vpop.f32.mrb[23].mxu1  ;;  %v1660_v23 = vadd.f32 %v1644_v19, %v3239_v31 }
 0x716   : > { %v1659_v28 = vadd.f32 %v1643_v8, %v3230_v27  ;;  %v1545_v52 = vadd.f32 %v3586_v49, %v1544_v17 }
 0x717   : > { %v1607_v54 = vmul.f32 %v3591_v61, %v1550_v48 }
 0x718   : > { %v1606_v18 = vmul.f32 %v3591_v61, %v1545_v52  ;;  %1675 = vxpose.xlu0.b32.cont [5/16] %v1659_v28, 128 }
 0x719   : > { %v1630_v24 = vadd.f32 %v3599_v7, %v1607_v54 }
 0x71a   : > { %v1629_v60 = vadd.f32 %v3599_v7, %v1606_v18 }
 0x71b   : > { %v1646_v27 = vmax.f32 %v1630_v24, 0.0 }
 0x71c   : > { %v1645_v55 = vmax.f32 %v1629_v60, 0.0  ;;  %v2327_v56 = vpop.f32.mrb[24].mxu1  ;;  %1676 = vxpose.xlu0.b32.cont [6/16] %v1660_v23, 128 }
 0x71d   : > { %v1560_v37 = vadd.f32 %v2327_v56, %v3586_v49  ;;  %v1554_v63 = vpop.f32.mrb[25].mxu1  ;;  %v1662_v31 = vadd.f32 %v1646_v27, %v3257_v39 }
 0x71e   : > { %v1661_v58 = vadd.f32 %v1645_v55, %v3248_v35  ;;  %v1555_v13 = vadd.f32 %v3586_v49, %v1554_v63 }
 0x71f   : > { %v1609_v21 = vmul.f32 %v3591_v61, %v1560_v37 }
 0x720   : > { %v1608_v36 = vmul.f32 %v3591_v61, %v1555_v13  ;;  %1677 = vxpose.xlu0.b32.cont [7/16] %v1661_v58, 128 }
 0x721   : > { %v1632_v22 = vadd.f32 %v3599_v7, %v1609_v21 }
 0x722   : > { %v1631_v2 = vadd.f32 %v3599_v7, %v1608_v36 }
 0x723   : > { %v1648_v35 = vmax.f32 %v1632_v22, 0.0 }
 0x724   : > { %v1647_v57 = vmax.f32 %v1631_v2, 0.0  ;;  %v2330_v0 = vpop.f32.mrb[26].mxu1  ;;  %1678 = vxpose.xlu0.b32.cont [8/16] %v1662_v31, 128 }
 0x725   : > { %v1570_v25 = vadd.f32 %v2330_v0, %v3586_v49  ;;  %v1564_v26 = vpop.f32.mrb[27].mxu1  ;;  %v1664_v39 = vadd.f32 %v1648_v35, %v3263_v41 }
 0x726   : > { %v1663_v4 = vadd.f32 %v1647_v57, %v3260_v40  ;;  %v1565_v53 = vadd.f32 %v3586_v49, %v1564_v26 }
 0x727   : > { %v1611_v59 = vmul.f32 %v3591_v61, %v1570_v25 }
 0x728   : > { %v1610_v14 = vmul.f32 %v3591_v61, %v1565_v53  ;;  %1679 = vxpose.xlu0.b32.cont [9/16] %v1663_v4, 128 }
 0x729   : > { %v1634_v5 = vadd.f32 %v3599_v7, %v1611_v59 }
 0x72a   : > { %v1633_v29 = vadd.f32 %v3599_v7, %v1610_v14 }
 0x72b   : > { %v1650_v40 = vmax.f32 %v1634_v5, 0.0 }
 0x72c   : > { %v1649_v1 = vmax.f32 %v1633_v29, 0.0  ;;  %v2333_v9 = vpop.f32.mrb[28].mxu1  ;;  %1680 = vxpose.xlu0.b32.cont [10/16] %v1664_v39, 128 }
 0x72d   : > { %v1580_v32 = vadd.f32 %v2333_v9, %v3586_v49  ;;  %v1574_v10 = vpop.f32.mrb[29].mxu1  ;;  %v1666_v41 = vadd.f32 %v1650_v40, %v3269_v43 }
 0x72e   : > { %v1665_v30 = vadd.f32 %v1649_v1, %v3266_v42  ;;  %v1575_v12 = vadd.f32 %v3586_v49, %v1574_v10 }
 0x72f   : > { %v1613_v6 = vmul.f32 %v3591_v61, %v1580_v32 }
 0x730   : > { %v1612_v62 = vmul.f32 %v3591_v61, %v1575_v12  ;;  %1681 = vxpose.xlu0.b32.cont [11/16] %v1665_v30, 128 }
 0x731   : > { %v1636_v51 = vadd.f32 %v3599_v7, %v1613_v6 }
 0x732   : > { %v1635_v11 = vadd.f32 %v3599_v7, %v1612_v62 }
 0x733   : > { %v1652_v42 = vmax.f32 %v1636_v51, 0.0 }
 0x734   : > { %v1651_v33 = vmax.f32 %v1635_v11, 0.0  ;;  %1682 = vxpose.xlu0.b32.cont [12/16] %v1666_v41, 128  ;;  %v2336_v34 = vpop.f32.mrb[30].mxu1 }
 0x735   : > { %v1590_v3 = vadd.f32 %v2336_v34, %v3586_v49  ;;  %v1584_v50 = vpop.f32.mrb[31].mxu1  ;;  %v1668_v8 = vadd.f32 %v1652_v42, %v3275_v45 }
 0x736   : > { %v1667_v15 = vadd.f32 %v1651_v33, %v3272_v44  ;;  %v1585_v16 = vadd.f32 %v3586_v49, %v1584_v50 }
 0x737   : > { %v1615_v38 = vmul.f32 %v3591_v61, %v1590_v3 }
 0x738   : > { %v1614_v43 = vmul.f32 %v3591_v61, %v1585_v16  ;;  %1683 = vxpose.xlu0.b32.cont [13/16] %v1667_v15, 128 }
 0x739   : > { %v1638_v20 = vadd.f32 %v3599_v7, %v1615_v38 }
 0x73a   : > { %v1637_v48 = vadd.f32 %v3599_v7, %v1614_v43 }
 0x73b   : > { %v1654_v19 = vmax.f32 %v1638_v20, 0.0 }
 0x73c   : > { %v1653_v17 = vmax.f32 %v1637_v48, 0.0  ;;  %1684 = vxpose.xlu0.b32.cont [14/16] %v1668_v8, 128 }
 0x73d   : > { %v1670_v44 = vadd.f32 %v1654_v19, %v3281_v47 }
 0x73e   : > { %v1669_v28 = vadd.f32 %v1653_v17, %v3278_v46 }
 0x740   : > { %1685 = vxpose.xlu0.b32.cont [15/16] %v1669_v28, 128 }
 0x744   : > { %1686 = vxpose.xlu0.b32.end [16/16] %v1670_v44, 128 }
 0x788   : > { %v1687_v49 = vpop.trf.xlu0 }
 0x789   : > { %1703 = vst [vmem:[%s3663_s22] sm:$0xff] %v1687_v49 }
 0x78c   : > { %v1688_v45 = vpop.trf.xlu0 }
 0x78d   : > { %1704 = vst [vmem:[%s3663_s22 + $0x8] sm:$0xff] %v1688_v45 }
 0x790   : > { %v1689_v46 = vpop.trf.xlu0 }
 0x791   : > { %1705 = vst [vmem:[%s3663_s22 + $0x10] sm:$0xff] %v1689_v46 }
 0x794   : > { %v1690_v47 = vpop.trf.xlu0 }
 0x795   : > { %1706 = vst [vmem:[%s3663_s22 + $0x18] sm:$0xff] %v1690_v47 }
 0x798   : > { %v1691_v61 = vpop.trf.xlu0 }
 0x799   : > { %1707 = vst [vmem:[%s3663_s22 + $0x20] sm:$0xff] %v1691_v61 }
 0x79c   : > { %v1692_v7 = vpop.trf.xlu0 }
 0x79d   : > { %1708 = vst [vmem:[%s3663_s22 + $0x28] sm:$0xff] %v1692_v7 }
 0x7a0   : > { %v1693_v52 = vpop.trf.xlu0 }
 0x7a1   : > { %1709 = vst [vmem:[%s3663_s22 + $0x30] sm:$0xff] %v1693_v52 }
 0x7a4   : > { %v1694_v54 = vpop.trf.xlu0 }
 0x7a5   : > { %1710 = vst [vmem:[%s3663_s22 + $0x38] sm:$0xff] %v1694_v54 }
 0x7a8   : > { %v1695_v18 = vpop.trf.xlu0 }
 0x7a9   : > { %1711 = vst [vmem:[%s3663_s22 + $0x40] sm:$0xff] %v1695_v18 }
 0x7ac   : > { %v1696_v23 = vpop.trf.xlu0 }
 0x7ad   : > { %1712 = vst [vmem:[%s3663_s22 + $0x48] sm:$0xff] %v1696_v23 }
 0x7b0   : > { %v1697_v24 = vpop.trf.xlu0 }
 0x7b1   : > { %1713 = vst [vmem:[%s3663_s22 + $0x50] sm:$0xff] %v1697_v24 }
 0x7b4   : > { %v1698_v60 = vpop.trf.xlu0 }
 0x7b5   : > { %1714 = vst [vmem:[%s3663_s22 + $0x58] sm:$0xff] %v1698_v60 }
 0x7b8   : > { %v1699_v55 = vpop.trf.xlu0 }
 0x7b9   : > { %1715 = vst [vmem:[%s3663_s22 + $0x60] sm:$0xff] %v1699_v55 }
 0x7bc   : > { %v1700_v56 = vpop.trf.xlu0 }
 0x7bd   : > { %1716 = vst [vmem:[%s3663_s22 + $0x68] sm:$0xff] %v1700_v56 }
 0x7c0   : > { %v1701_v37 = vpop.trf.xlu0 }
 0x7c1   : > { %1717 = vst [vmem:[%s3663_s22 + $0x70] sm:$0xff] %v1701_v37 }
 0x7c4   : > { %v1702_v63 = vpop.trf.xlu0 }
 0x7c5   : > { %1718 = vst [vmem:[%s3663_s22 + $0x78] sm:$0xff] %v1702_v63 }
 0x7c6   : > { %2776 = shalt.err (!%p2773_p6)
}
 0x7c7   : > { %s2777_s0 = scalar_lea.hbm %s3685_s11, 2048  ;;  %s2781_s16 = scalar_lea.hbm %s3780_s28, 4096 }
 0x7c8   : > { %p2778_p8 = scmp.ne.s32.totalorder %s3685_s11, %s2777_s0  ;;  %p2782_p4 = scmp.lt.u32.totalorder %s3685_s11, %s3780_s28 }
 0x7c9   : > { %p2783_p11 = scmp.lt.u32.totalorder %s2781_s16, %s2777_s0  ;;  %p2785_p3 = scmp.lt.u32.totalorder %s2777_s0, %s3685_s11 }
 0x7ca   : > { %p2779_p10 = pnand %p2778_p8, %p2991_p12 }
 0x7cb   : > { %p2784_p13 = por %p2783_p11, %p2782_p4 }
 0x7cc   : > { %p2780_p0 = pneg %p2779_p10 }
 0x7cd   : > { %p2786_p7 = por %p2785_p3, %p2784_p13 }
 0x7cf   : > { %p2787_p9 = pnand %p2786_p7, %p2780_p0 }
 0x7d1   : > { %2790 = shalt.err (!%p2787_p9)
}
 0x7d2   : > { %s2845_s14 = smov 128   ;;  %s2846_s27 = smov 8  }
 0x7d3   : > { %2521 = dma.vmem_to_hbm [thread:$0]  (%p2991_p12), %s3687_s24, 2048, %s3685_s11, %s1720_s30, %s2845_s14, %s2845_s14, %s2846_s27  }
 0x7d4 PF: > { %s3781_s22 = sld [smem:[#allocation13_spill]]  ;;  %s3782_s21 = sld [smem:[#allocation15_spill]] }
 0x7d5   : > { %p3784_p5 = scmp.ge.s32.totalorder %s2837_s12, 2 }
 0x7da   : > { %s1748_s5 = sand.u32 1, %s3781_s22   ;;  %p3783_p1 = scmp.ne.s32.totalorder %s3782_s21, 0 }
 0x7db   : > { %s1749_s20 = scalar_lea.sflag [#allocation4], %s1748_s5 }
 0x7dc   : > { %p2535_p2 = pnand %p3784_p5, %p3783_p1 }
 0x7de   : > { %2820 = dma.done.wait (!%p2535_p2), %s1749_s20, 2048  }
 0x7df   : > { %2822 = vsyncadd (!%p2535_p2), %s1749_s20, 4294965248  ;;  %s3785_s12 = sld [smem:[#allocation16_spill]]  ;;  %s3786_s18 = sld [smem:[#allocation14_spill]] }
 0x7e0   : > { %s3787_s11 = sld [smem:[#allocation17_spill]]  ;;  %s3788_s30 = smov %s2829_s10 }
 0x7e5   : > { %p25_p6 = scmp.ge.s32.totalorder %s3785_s12, 4   ;;  %s3789_s10 = smov %s3786_s18 }
 0x7e7   :  { %27 = sbr.rel (!%p25_p6) target bundleno = 11 (0xb), region = 118 }
 0x7ee   :  { %1754 = vsyncpa [#allocation3], 1 }
 0x7ef   :  { %1756 = vsyncpa [#allocation3 + $0x1], 1 }
 0x7f0   :  { %1757 = vsyncpa [#allocation6], 1 }
 0x7f1   :  { %1759 = vsyncpa [#allocation6 + $0x1], 1 }
 0x7f2   :  { %1760 = vsyncpa [#allocation4], 1 }
 0x7f3   :  { %1762 = vsyncpa [#allocation4 + $0x1], 1 }

</bundles_post_ra>
